<compile_context>
chip_gen: v7x
topology: tpu7x:2x2x1
jax: 0.10.0
libtpu: 0.0.40
codegen_flags: <defaults>
</compile_context>

<pallas_src>
import functools

import jax
import jax.numpy as jnp
from jax.experimental import pallas as pl
from jax.experimental.pallas import tpu as pltpu


def _window_attention_kernel(x_ref, wqkv_t_ref, bqkv_ref, relb_ref,
                             wp_t_ref, bp_ref, o_ref, acc_ref, *, num_heads):
    """One grid step processes a block of Wb windows.

    x_ref:      (Wb, Np, C)    Wb windows, token axis padded to Np (sublane aligned)
    wqkv_t_ref: (C, 3C)        pre-transposed qkv weight (q columns pre-scaled)
    bqkv_ref:   (1, 3C)        qkv bias (q part pre-scaled), f32
    relb_ref:   (H, Np, Np)    relative position bias (+ -1e9 key-pad mask), f32
    wp_t_ref:   (C, Cp)        pre-transposed proj weight, out cols zero-padded to Cp
    bp_ref:     (1, Cp)        proj bias (zero in padded columns), f32
    o_ref:      (Wb, Np, Cp)   output (lane-dense: Cp is a multiple of 128)
    acc_ref:    (Wb, Np, C)    x.dtype VMEM scratch for concatenated head outputs
    """
    Wb, Np, C = x_ref.shape
    Cp = o_ref.shape[-1]
    hd = C // num_heads
    M = Wb * Np
    in_dt = x_ref.dtype

    # Fused qkv projection over all Wb*Np tokens: one big MXU matmul with K = C.
    x = x_ref[...].reshape(M, C)
    qkv = jnp.dot(x, wqkv_t_ref[...], preferred_element_type=jnp.float32)
    # Single cast right after the bias add: (M, 3C) is the largest live
    # intermediate; keeping it in the input dtype halves its VMEM footprint on
    # the bf16 path and removes the 3*H per-head casts.
    qkv = (qkv + bqkv_ref[...]).astype(in_dt)
    qkv = qkv.reshape(Wb, Np, 3 * C)

    # Per-head attention, batched over the window axis (dense MXU issue stream,
    # heads issued back-to-back in the unrolled loop).
    for h in range(num_heads):
        q = qkv[:, :, h * hd:(h + 1) * hd]                             # (Wb, Np, hd)
        k = qkv[:, :, C + h * hd:C + (h + 1) * hd]
        v = qkv[:, :, 2 * C + h * hd:2 * C + (h + 1) * hd]

        s = jnp.einsum('bnd,bmd->bnm', q, k,
                       preferred_element_type=jnp.float32)             # (Wb, Np, Np)
        s = s + relb_ref[h][None]

        m = jnp.max(s, axis=-1, keepdims=True)
        p = jnp.exp(s - m)
        inv = pl.reciprocal(jnp.sum(p, axis=-1, keepdims=True), approx=True)

        pv = jnp.einsum('bnm,bmd->bnd', p.astype(in_dt), v,
                        preferred_element_type=jnp.float32)            # (Wb, Np, hd)
        # Normalize after the PV matmul: Np*hd multiplies instead of Np*Np.
        acc_ref[:, :, h * hd:(h + 1) * hd] = (pv * inv).astype(in_dt)

    # Output projection with the full K = C contraction (full MXU depth),
    # written to a lane-dense (Cp multiple of 128) output block.
    out = acc_ref[...].reshape(M, C)
    y = jnp.dot(out, wp_t_ref[...], preferred_element_type=jnp.float32)
    y = y + bp_ref[...]
    o_ref[...] = y.reshape(Wb, Np, Cp).astype(o_ref.dtype)


def _default_vmem_limit_bytes():
    """~75% of physical VMEM: ~48 MiB on v7x (64 MiB/TC), ~96 MiB on v5e/v6e."""
    cap = 64 * 1024 * 1024  # conservative fallback
    try:
        cap = int(pltpu.get_tpu_info().vmem_capacity_bytes)
    except Exception:
        pass
    return max(32 * 1024 * 1024, min(3 * cap // 4, 112 * 1024 * 1024))


def _pick_block_windows(B_, Np, C, Cp, num_heads, xbytes, block_windows, vmem_limit):
    """Largest windows-per-step block whose working set fits the VMEM budget."""
    f32b = 4
    per_win = (2 * Np * C * xbytes        # x block (double-buffered)
               + 2 * Np * Cp * xbytes     # out block (double-buffered)
               + Np * C * xbytes          # head-output scratch
               + Np * 3 * C * f32b        # f32 qkv before the single cast
               + Np * 3 * C * xbytes      # qkv in the input dtype
               + 2 * Np * Np * f32b       # scores + probs for one live head
               + Np * Cp * f32b)          # f32 projection accumulator
    # Constant operands: the pipeline still double-buffers them, count twice.
    fixed = 2 * (3 * C * C * xbytes + 3 * C * f32b
                 + num_heads * Np * Np * f32b
                 + C * Cp * xbytes + Cp * f32b)
    budget = int(0.85 * vmem_limit) - fixed
    wb = max(1, budget // max(1, per_win))
    wb = min(wb, block_windows, B_)
    if B_ >= 2:
        # >= 2 grid steps so the "parallel" axis shards across v7x's 2 TCs.
        wb = min(wb, (B_ + 1) // 2)
    return max(1, int(wb))


def window_attention(x, wqkv, bqkv, rel_bias, wp, bp, *, num_heads, scale,
                     block_windows=128, vmem_limit_bytes=None):
    """x: (B_, N, C); rel_bias: (num_heads, N, N). Output dtype == x.dtype."""
    B_, N, C = x.shape
    dt = x.dtype
    xbytes = jnp.dtype(dt).itemsize

    if vmem_limit_bytes is None:
        vmem_limit_bytes = _default_vmem_limit_bytes()

    # Token axis padded so in-kernel (Wb, Np, C) <-> (Wb*Np, C) reshapes stay
    # sublane-tile aligned (8 rows for 32-bit dtypes, 16 for 16-bit).
    sub = 8 * (4 // xbytes)
    Np = ((N + sub - 1) // sub) * sub
    # Lane-dense output: pad proj output columns up to a multiple of 128.
    Cp = ((C + 127) // 128) * 128

    # Windows per grid step from the per-generation VMEM budget (amortizes the
    # ~0.35 us per-step pipeline overhead and keeps the projection matmul's M
    # dimension large), while guaranteeing >= 2 grid steps when possible.
    Wb = _pick_block_windows(B_, Np, C, Cp, num_heads, xbytes,
                             block_windows, vmem_limit_bytes)
    B_pad = ((B_ + Wb - 1) // Wb) * Wb
    num_blocks = B_pad // Wb

    xp = jnp.pad(x, ((0, B_pad - B_), (0, Np - N), (0, 0)))

    # Pre-transpose weights (torch Linear layout is (out, in)), fold the qk
    # scale into the q slice of the qkv projection, and zero-pad the proj
    # output columns to Cp -- all free wrapper-side work.
    wqkv_t = wqkv.astype(jnp.float32).T                                # (C, 3C)
    wqkv_t = wqkv_t.at[:, :C].multiply(scale).astype(dt)
    bqkv2 = bqkv.astype(jnp.float32).at[:C].multiply(scale).reshape(1, 3 * C)
    wp_t = jnp.zeros((C, Cp), jnp.float32).at[:, :C].set(
        wp.astype(jnp.float32).T).astype(dt)                           # (C, Cp)
    bp2 = jnp.zeros((1, Cp), jnp.float32).at[0, :C].set(bp.astype(jnp.float32))

    # Relative-position bias padded to (H, Np, Np); padded key columns get a
    # large negative bias so softmax gives them exactly zero weight.
    relb = jnp.pad(rel_bias.astype(jnp.float32),
                   ((0, 0), (0, Np - N), (0, Np - N)))
    relb = relb.at[:, :, N:].set(-1e9)

    kernel = functools.partial(_window_attention_kernel, num_heads=num_heads)

    out = pl.pallas_call(
        kernel,
        out_shape=jax.ShapeDtypeStruct((B_pad, Np, Cp), dt),
        grid_spec=pltpu.PrefetchScalarGridSpec(
            num_scalar_prefetch=0,
            grid=(num_blocks,),
            in_specs=[
                pl.BlockSpec((Wb, Np, C), lambda i: (i, 0, 0)),           # x
                pl.BlockSpec((C, 3 * C), lambda i: (0, 0)),               # Wqkv^T
                pl.BlockSpec((1, 3 * C), lambda i: (0, 0)),               # bqkv
                pl.BlockSpec((num_heads, Np, Np), lambda i: (0, 0, 0)),   # rel bias
                pl.BlockSpec((C, Cp), lambda i: (0, 0)),                  # Wproj^T
                pl.BlockSpec((1, Cp), lambda i: (0, 0)),                  # bproj
            ],
            out_specs=pl.BlockSpec((Wb, Np, Cp), lambda i: (i, 0, 0)),
            scratch_shapes=[pltpu.VMEM((Wb, Np, C), dt)],
        ),
        compiler_params=pltpu.CompilerParams(
            dimension_semantics=("parallel",),
            vmem_limit_bytes=vmem_limit_bytes),
    )(xp, wqkv_t, bqkv2, relb, wp_t, bp2)

    return out[:B_, :N, :C]


def make_relative_position_index(window_size):
    """Identical to the PyTorch buffer construction (plain JAX glue)."""
    Wh, Ww = window_size
    coords_h = jnp.arange(Wh)
    coords_w = jnp.arange(Ww)
    coords = jnp.stack(jnp.meshgrid(coords_h, coords_w, indexing="ij"))  # (2, Wh, Ww)
    coords_flatten = coords.reshape(2, -1)                               # (2, N)
    rel = coords_flatten[:, :, None] - coords_flatten[:, None, :]        # (2, N, N)
    rel = rel.transpose(1, 2, 0)                                         # (N, N, 2)
    rel = rel.at[:, :, 0].add(Wh - 1)
    rel = rel.at[:, :, 1].add(Ww - 1)
    rel = rel.at[:, :, 0].multiply(2 * Ww - 1)
    return rel.sum(-1)                                                   # (N, N)


def reference_window_attention(x, wqkv, bqkv, rel_bias, wp, bp, *, num_heads, scale):
    """Pure-JAX reference mirroring the PyTorch forward (mask=None)."""
    B_, N, C = x.shape
    hd = C // num_heads
    qkv = (x @ wqkv.T + bqkv).reshape(B_, N, 3, num_heads, hd).transpose(2, 0, 3, 1, 4)
    q, k, v = qkv[0], qkv[1], qkv[2]
    q = q * scale
    attn = q @ jnp.swapaxes(k, -2, -1)            # (B_, H, N, N)
    attn = attn + rel_bias[None]
    attn = jax.nn.softmax(attn, axis=-1)
    out = (attn @ v).transpose(0, 2, 1, 3).reshape(B_, N, C)
    return out @ wp.T + bp


if __name__ == "__main__":
    # Small but consistent configuration: window 7x7 -> N = 49.
    dim = 32
    num_heads = 4
    window_size = (7, 7)
    N = window_size[0] * window_size[1]
    B_ = 2                      # num_windows * batch
    head_dim = dim // num_heads
    scale = head_dim ** (-0.5)

    key = jax.random.PRNGKey(0)
    kx, kt, kw1, kb1, kw2, kb2 = jax.random.split(key, 6)

    x = jax.random.normal(kx, (B_, N, dim), dtype=jnp.float32)

    # Parameters (deterministic init; trunc_normal approximated by normal*0.02).
    n_rel = (2 * window_size[0] - 1) * (2 * window_size[1] - 1)
    rel_table = 0.02 * jax.random.normal(kt, (n_rel, num_heads), dtype=jnp.float32)
    wqkv = 0.05 * jax.random.normal(kw1, (3 * dim, dim), dtype=jnp.float32)
    bqkv = 0.01 * jax.random.normal(kb1, (3 * dim,), dtype=jnp.float32)
    wp = 0.05 * jax.random.normal(kw2, (dim, dim), dtype=jnp.float32)
    bp = 0.01 * jax.random.normal(kb2, (dim,), dtype=jnp.float32)

    # Gather the relative position bias once in plain JAX (glue), shape (H, N, N).
    rel_index = make_relative_position_index(window_size)        # (N, N) int
    rel_bias = rel_table[rel_index.reshape(-1)].reshape(N, N, num_heads)
    rel_bias = rel_bias.transpose(2, 0, 1)                       # (H, N, N)

    # TODO(synk): optional `mask` argument (shifted-window attention) not wired in;
    # mask=None path is implemented exactly.

    ref = reference_window_attention(x, wqkv, bqkv, rel_bias, wp, bp,
                                     num_heads=num_heads, scale=scale)

    # f32 path (approx reciprocal in softmax -> tolerance slightly loosened).
    out_f32 = window_attention(x, wqkv, bqkv, rel_bias, wp, bp,
                               num_heads=num_heads, scale=scale)
    out_f32 = jax.block_until_ready(out_f32)
    assert out_f32.shape == (B_, N, dim)
    err = float(jnp.max(jnp.abs(out_f32 - ref)))
    assert err < 2e-3, f"f32 max abs err {err}"

    # bf16 path (halves HBM traffic; bf16-native MXU on v6e/v7x; f32 accumulation).
    out_bf16 = window_attention(x.astype(jnp.bfloat16), wqkv, bqkv, rel_bias,
                                wp, bp, num_heads=num_heads, scale=scale)
    out_bf16 = jax.block_until_ready(out_bf16).astype(jnp.float32)
    assert out_bf16.shape == (B_, N, dim)
    err_bf = float(jnp.max(jnp.abs(out_bf16 - ref)))
    assert err_bf < 5e-2, f"bf16 max abs err {err_bf}"

    print("KERNEL_OK")
</pallas_src>

<mosaic_0001>
module attributes {stable_mosaic.version = 11 : i64} {
  func.func @_window_attention_kernel(%arg0: i32, %arg1: memref<1x56x32xf32, #tpu.memory_space<vmem>>, %arg2: memref<32x96xf32, #tpu.memory_space<vmem>>, %arg3: memref<1x96xf32, #tpu.memory_space<vmem>>, %arg4: memref<4x56x56xf32, #tpu.memory_space<vmem>>, %arg5: memref<32x128xf32, #tpu.memory_space<vmem>>, %arg6: memref<1x128xf32, #tpu.memory_space<vmem>>, %arg7: memref<1x56x128xf32, #tpu.memory_space<vmem>>, %arg8: memref<1x56x32xf32, #tpu.memory_space<vmem>>) attributes {dimension_semantics = [#tpu.dimension_semantics<parallel>], iteration_bounds = array<i64: 2>, scalar_prefetch = 0 : i64, scratch_operands = 1 : i64, tpu.core_type = #tpu.core_type<tc>, window_params = [{transform_indices = @transform_0, window_bounds = array<i64: 1, 56, 32>}, {pipeline_mode = #tpu.pipeline_mode<synchronous>, transform_indices = @transform_1, window_bounds = array<i64: 32, 96>}, {pipeline_mode = #tpu.pipeline_mode<synchronous>, transform_indices = @transform_2, window_bounds = array<i64: 1, 96>}, {pipeline_mode = #tpu.pipeline_mode<synchronous>, transform_indices = @transform_3, window_bounds = array<i64: 4, 56, 56>}, {pipeline_mode = #tpu.pipeline_mode<synchronous>, transform_indices = @transform_4, window_bounds = array<i64: 32, 128>}, {pipeline_mode = #tpu.pipeline_mode<synchronous>, transform_indices = @transform_5, window_bounds = array<i64: 1, 128>}, {transform_indices = @transform_6, window_bounds = array<i64: 1, 56, 128>}]} {
    %c0 = arith.constant 0 : index
    %c0_0 = arith.constant 0 : index
    %c0_1 = arith.constant 0 : index
    %0 = vector.load %arg1[%c0, %c0_0, %c0_1] : memref<1x56x32xf32, #tpu.memory_space<vmem>>, vector<1x56x32xf32>
    %1 = vector.shape_cast %0 : vector<1x56x32xf32> to vector<56x32xf32>
    %c0_2 = arith.constant 0 : index
    %c0_3 = arith.constant 0 : index
    %2 = vector.load %arg2[%c0_2, %c0_3] : memref<32x96xf32, #tpu.memory_space<vmem>>, vector<32x96xf32>
    %cst = arith.constant dense<0.000000e+00> : vector<56x96xf32>
    %3 = tpu.matmul %1, %2, %cst {dimension_numbers = #tpu.dot_dimension_numbers<[1], [0], [0], [1], [0, 0, 1, 1], [], []>} : vector<56x32xf32>, vector<32x96xf32>, vector<56x96xf32> -> vector<56x96xf32>
    %c0_4 = arith.constant 0 : index
    %c0_5 = arith.constant 0 : index
    %4 = vector.load %arg3[%c0_4, %c0_5] : memref<1x96xf32, #tpu.memory_space<vmem>>, vector<1x96xf32>
    %5 = vector.broadcast %4 : vector<1x96xf32> to vector<56x96xf32>
    %6 = arith.addf %3, %5 : vector<56x96xf32>
    %7 = vector.shape_cast %6 : vector<56x96xf32> to vector<1x56x96xf32>
    %8 = vector.extract_strided_slice %7 {offsets = [0, 0, 0], sizes = [1, 56, 8], strides = [1, 1, 1]} : vector<1x56x96xf32> to vector<1x56x8xf32>
    %9 = vector.extract_strided_slice %7 {offsets = [0, 0, 32], sizes = [1, 56, 8], strides = [1, 1, 1]} : vector<1x56x96xf32> to vector<1x56x8xf32>
    %10 = vector.extract_strided_slice %7 {offsets = [0, 0, 64], sizes = [1, 56, 8], strides = [1, 1, 1]} : vector<1x56x96xf32> to vector<1x56x8xf32>
    "tpu.trace_start"() <{level = 10 : i32, message = "bnd,bmd->bnm"}> : () -> ()
    %cst_6 = arith.constant dense<0.000000e+00> : vector<1x56x56xf32>
    %11 = tpu.matmul %8, %9, %cst_6 {dimension_numbers = #tpu.dot_dimension_numbers<[2], [2], [1], [1], [0, 0, 0, 1, 1, 1], [0], [0]>} : vector<1x56x8xf32>, vector<1x56x8xf32>, vector<1x56x56xf32> -> vector<1x56x56xf32>
    "tpu.trace_stop"() : () -> ()
    %c0_7 = arith.constant 0 : index
    %c0_8 = arith.constant 0 : index
    %c0_9 = arith.constant 0 : index
    %12 = vector.load %arg4[%c0_7, %c0_8, %c0_9] : memref<4x56x56xf32, #tpu.memory_space<vmem>>, vector<1x56x56xf32>
    %13 = vector.shape_cast %12 : vector<1x56x56xf32> to vector<56x56xf32>
    %14 = vector.shape_cast %13 : vector<56x56xf32> to vector<1x56x56xf32>
    %15 = arith.addf %11, %14 : vector<1x56x56xf32>
    %cst_10 = arith.constant dense<0xFF800000> : vector<1x56xf32>
    %16 = vector.multi_reduction <maximumf>, %15, %cst_10 [2] : vector<1x56x56xf32> to vector<1x56xf32>
    %17 = vector.shape_cast %16 : vector<1x56xf32> to vector<1x56x1xf32>
    %18 = vector.broadcast %17 : vector<1x56x1xf32> to vector<1x56x56xf32>
    %19 = arith.subf %15, %18 : vector<1x56x56xf32>
    %20 = math.exp %19 : vector<1x56x56xf32>
    %cst_11 = arith.constant dense<0.000000e+00> : vector<1x56xf32>
    %21 = vector.multi_reduction <add>, %20, %cst_11 [2] : vector<1x56x56xf32> to vector<1x56xf32>
    %22 = vector.shape_cast %21 : vector<1x56xf32> to vector<1x56x1xf32>
    %23 = tpu.reciprocal %22 {approx = true} : vector<1x56x1xf32> -> vector<1x56x1xf32>
    "tpu.trace_start"() <{level = 10 : i32, message = "bnm,bmd->bnd"}> : () -> ()
    %cst_12 = arith.constant dense<0.000000e+00> : vector<1x56x8xf32>
    %24 = tpu.matmul %20, %10, %cst_12 {dimension_numbers = #tpu.dot_dimension_numbers<[2], [1], [1], [2], [0, 0, 0, 1, 1, 2], [0], [0]>} : vector<1x56x56xf32>, vector<1x56x8xf32>, vector<1x56x8xf32> -> vector<1x56x8xf32>
    "tpu.trace_stop"() : () -> ()
    %25 = vector.broadcast %23 : vector<1x56x1xf32> to vector<1x56x8xf32>
    %26 = arith.mulf %24, %25 : vector<1x56x8xf32>
    %c0_13 = arith.constant 0 : index
    %c0_14 = arith.constant 0 : index
    %c0_15 = arith.constant 0 : index
    %27 = vector.load %arg8[%c0_13, %c0_14, %c0_15] : memref<1x56x32xf32, #tpu.memory_space<vmem>>, vector<1x56x8xf32>
    tpu.vector_store %arg8[%c0_13, %c0_14, %c0_15], %26 {strides = array<i32>} : memref<1x56x32xf32, #tpu.memory_space<vmem>>, vector<1x56x8xf32>,
    %28 = vector.extract_strided_slice %7 {offsets = [0, 0, 8], sizes = [1, 56, 8], strides = [1, 1, 1]} : vector<1x56x96xf32> to vector<1x56x8xf32>
    %29 = vector.extract_strided_slice %7 {offsets = [0, 0, 40], sizes = [1, 56, 8], strides = [1, 1, 1]} : vector<1x56x96xf32> to vector<1x56x8xf32>
    %30 = vector.extract_strided_slice %7 {offsets = [0, 0, 72], sizes = [1, 56, 8], strides = [1, 1, 1]} : vector<1x56x96xf32> to vector<1x56x8xf32>
    "tpu.trace_start"() <{level = 10 : i32, message = "bnd,bmd->bnm"}> : () -> ()
    %cst_16 = arith.constant dense<0.000000e+00> : vector<1x56x56xf32>
    %31 = tpu.matmul %28, %29, %cst_16 {dimension_numbers = #tpu.dot_dimension_numbers<[2], [2], [1], [1], [0, 0, 0, 1, 1, 1], [0], [0]>} : vector<1x56x8xf32>, vector<1x56x8xf32>, vector<1x56x56xf32> -> vector<1x56x56xf32>
    "tpu.trace_stop"() : () -> ()
    %c1 = arith.constant 1 : index
    %c0_17 = arith.constant 0 : index
    %c0_18 = arith.constant 0 : index
    %32 = vector.load %arg4[%c1, %c0_17, %c0_18] : memref<4x56x56xf32, #tpu.memory_space<vmem>>, vector<1x56x56xf32>
    %33 = vector.shape_cast %32 : vector<1x56x56xf32> to vector<56x56xf32>
    %34 = vector.shape_cast %33 : vector<56x56xf32> to vector<1x56x56xf32>
    %35 = arith.addf %31, %34 : vector<1x56x56xf32>
    %cst_19 = arith.constant dense<0xFF800000> : vector<1x56xf32>
    %36 = vector.multi_reduction <maximumf>, %35, %cst_19 [2] : vector<1x56x56xf32> to vector<1x56xf32>
    %37 = vector.shape_cast %36 : vector<1x56xf32> to vector<1x56x1xf32>
    %38 = vector.broadcast %37 : vector<1x56x1xf32> to vector<1x56x56xf32>
    %39 = arith.subf %35, %38 : vector<1x56x56xf32>
    %40 = math.exp %39 : vector<1x56x56xf32>
    %cst_20 = arith.constant dense<0.000000e+00> : vector<1x56xf32>
    %41 = vector.multi_reduction <add>, %40, %cst_20 [2] : vector<1x56x56xf32> to vector<1x56xf32>
    %42 = vector.shape_cast %41 : vector<1x56xf32> to vector<1x56x1xf32>
    %43 = tpu.reciprocal %42 {approx = true} : vector<1x56x1xf32> -> vector<1x56x1xf32>
    "tpu.trace_start"() <{level = 10 : i32, message = "bnm,bmd->bnd"}> : () -> ()
    %cst_21 = arith.constant dense<0.000000e+00> : vector<1x56x8xf32>
    %44 = tpu.matmul %40, %30, %cst_21 {dimension_numbers = #tpu.dot_dimension_numbers<[2], [1], [1], [2], [0, 0, 0, 1, 1, 2], [0], [0]>} : vector<1x56x56xf32>, vector<1x56x8xf32>, vector<1x56x8xf32> -> vector<1x56x8xf32>
    "tpu.trace_stop"() : () -> ()
    %45 = vector.broadcast %43 : vector<1x56x1xf32> to vector<1x56x8xf32>
    %46 = arith.mulf %44, %45 : vector<1x56x8xf32>
    %c0_22 = arith.constant 0 : index
    %c0_23 = arith.constant 0 : index
    %c8 = arith.constant 8 : index
    %47 = vector.load %arg8[%c0_22, %c0_23, %c8] : memref<1x56x32xf32, #tpu.memory_space<vmem>>, vector<1x56x8xf32>
    tpu.vector_store %arg8[%c0_22, %c0_23, %c8], %46 {strides = array<i32>} : memref<1x56x32xf32, #tpu.memory_space<vmem>>, vector<1x56x8xf32>,
    %48 = vector.extract_strided_slice %7 {offsets = [0, 0, 16], sizes = [1, 56, 8], strides = [1, 1, 1]} : vector<1x56x96xf32> to vector<1x56x8xf32>
    %49 = vector.extract_strided_slice %7 {offsets = [0, 0, 48], sizes = [1, 56, 8], strides = [1, 1, 1]} : vector<1x56x96xf32> to vector<1x56x8xf32>
    %50 = vector.extract_strided_slice %7 {offsets = [0, 0, 80], sizes = [1, 56, 8], strides = [1, 1, 1]} : vector<1x56x96xf32> to vector<1x56x8xf32>
    "tpu.trace_start"() <{level = 10 : i32, message = "bnd,bmd->bnm"}> : () -> ()
    %cst_24 = arith.constant dense<0.000000e+00> : vector<1x56x56xf32>
    %51 = tpu.matmul %48, %49, %cst_24 {dimension_numbers = #tpu.dot_dimension_numbers<[2], [2], [1], [1], [0, 0, 0, 1, 1, 1], [0], [0]>} : vector<1x56x8xf32>, vector<1x56x8xf32>, vector<1x56x56xf32> -> vector<1x56x56xf32>
    "tpu.trace_stop"() : () -> ()
    %c2 = arith.constant 2 : index
    %c0_25 = arith.constant 0 : index
    %c0_26 = arith.constant 0 : index
    %52 = vector.load %arg4[%c2, %c0_25, %c0_26] : memref<4x56x56xf32, #tpu.memory_space<vmem>>, vector<1x56x56xf32>
    %53 = vector.shape_cast %52 : vector<1x56x56xf32> to vector<56x56xf32>
    %54 = vector.shape_cast %53 : vector<56x56xf32> to vector<1x56x56xf32>
    %55 = arith.addf %51, %54 : vector<1x56x56xf32>
    %cst_27 = arith.constant dense<0xFF800000> : vector<1x56xf32>
    %56 = vector.multi_reduction <maximumf>, %55, %cst_27 [2] : vector<1x56x56xf32> to vector<1x56xf32>
    %57 = vector.shape_cast %56 : vector<1x56xf32> to vector<1x56x1xf32>
    %58 = vector.broadcast %57 : vector<1x56x1xf32> to vector<1x56x56xf32>
    %59 = arith.subf %55, %58 : vector<1x56x56xf32>
    %60 = math.exp %59 : vector<1x56x56xf32>
    %cst_28 = arith.constant dense<0.000000e+00> : vector<1x56xf32>
    %61 = vector.multi_reduction <add>, %60, %cst_28 [2] : vector<1x56x56xf32> to vector<1x56xf32>
    %62 = vector.shape_cast %61 : vector<1x56xf32> to vector<1x56x1xf32>
    %63 = tpu.reciprocal %62 {approx = true} : vector<1x56x1xf32> -> vector<1x56x1xf32>
    "tpu.trace_start"() <{level = 10 : i32, message = "bnm,bmd->bnd"}> : () -> ()
    %cst_29 = arith.constant dense<0.000000e+00> : vector<1x56x8xf32>
    %64 = tpu.matmul %60, %50, %cst_29 {dimension_numbers = #tpu.dot_dimension_numbers<[2], [1], [1], [2], [0, 0, 0, 1, 1, 2], [0], [0]>} : vector<1x56x56xf32>, vector<1x56x8xf32>, vector<1x56x8xf32> -> vector<1x56x8xf32>
    "tpu.trace_stop"() : () -> ()
    %65 = vector.broadcast %63 : vector<1x56x1xf32> to vector<1x56x8xf32>
    %66 = arith.mulf %64, %65 : vector<1x56x8xf32>
    %c0_30 = arith.constant 0 : index
    %c0_31 = arith.constant 0 : index
    %c16 = arith.constant 16 : index
    %67 = vector.load %arg8[%c0_30, %c0_31, %c16] : memref<1x56x32xf32, #tpu.memory_space<vmem>>, vector<1x56x8xf32>
    tpu.vector_store %arg8[%c0_30, %c0_31, %c16], %66 {strides = array<i32>} : memref<1x56x32xf32, #tpu.memory_space<vmem>>, vector<1x56x8xf32>,
    %68 = vector.extract_strided_slice %7 {offsets = [0, 0, 24], sizes = [1, 56, 8], strides = [1, 1, 1]} : vector<1x56x96xf32> to vector<1x56x8xf32>
    %69 = vector.extract_strided_slice %7 {offsets = [0, 0, 56], sizes = [1, 56, 8], strides = [1, 1, 1]} : vector<1x56x96xf32> to vector<1x56x8xf32>
    %70 = vector.extract_strided_slice %7 {offsets = [0, 0, 88], sizes = [1, 56, 8], strides = [1, 1, 1]} : vector<1x56x96xf32> to vector<1x56x8xf32>
    "tpu.trace_start"() <{level = 10 : i32, message = "bnd,bmd->bnm"}> : () -> ()
    %cst_32 = arith.constant dense<0.000000e+00> : vector<1x56x56xf32>
    %71 = tpu.matmul %68, %69, %cst_32 {dimension_numbers = #tpu.dot_dimension_numbers<[2], [2], [1], [1], [0, 0, 0, 1, 1, 1], [0], [0]>} : vector<1x56x8xf32>, vector<1x56x8xf32>, vector<1x56x56xf32> -> vector<1x56x56xf32>
    "tpu.trace_stop"() : () -> ()
    %c3 = arith.constant 3 : index
    %c0_33 = arith.constant 0 : index
    %c0_34 = arith.constant 0 : index
    %72 = vector.load %arg4[%c3, %c0_33, %c0_34] : memref<4x56x56xf32, #tpu.memory_space<vmem>>, vector<1x56x56xf32>
    %73 = vector.shape_cast %72 : vector<1x56x56xf32> to vector<56x56xf32>
    %74 = vector.shape_cast %73 : vector<56x56xf32> to vector<1x56x56xf32>
    %75 = arith.addf %71, %74 : vector<1x56x56xf32>
    %cst_35 = arith.constant dense<0xFF800000> : vector<1x56xf32>
    %76 = vector.multi_reduction <maximumf>, %75, %cst_35 [2] : vector<1x56x56xf32> to vector<1x56xf32>
    %77 = vector.shape_cast %76 : vector<1x56xf32> to vector<1x56x1xf32>
    %78 = vector.broadcast %77 : vector<1x56x1xf32> to vector<1x56x56xf32>
    %79 = arith.subf %75, %78 : vector<1x56x56xf32>
    %80 = math.exp %79 : vector<1x56x56xf32>
    %cst_36 = arith.constant dense<0.000000e+00> : vector<1x56xf32>
    %81 = vector.multi_reduction <add>, %80, %cst_36 [2] : vector<1x56x56xf32> to vector<1x56xf32>
    %82 = vector.shape_cast %81 : vector<1x56xf32> to vector<1x56x1xf32>
    %83 = tpu.reciprocal %82 {approx = true} : vector<1x56x1xf32> -> vector<1x56x1xf32>
    "tpu.trace_start"() <{level = 10 : i32, message = "bnm,bmd->bnd"}> : () -> ()
    %cst_37 = arith.constant dense<0.000000e+00> : vector<1x56x8xf32>
    %84 = tpu.matmul %80, %70, %cst_37 {dimension_numbers = #tpu.dot_dimension_numbers<[2], [1], [1], [2], [0, 0, 0, 1, 1, 2], [0], [0]>} : vector<1x56x56xf32>, vector<1x56x8xf32>, vector<1x56x8xf32> -> vector<1x56x8xf32>
    "tpu.trace_stop"() : () -> ()
    %85 = vector.broadcast %83 : vector<1x56x1xf32> to vector<1x56x8xf32>
    %86 = arith.mulf %84, %85 : vector<1x56x8xf32>
    %c0_38 = arith.constant 0 : index
    %c0_39 = arith.constant 0 : index
    %c24 = arith.constant 24 : index
    %87 = vector.load %arg8[%c0_38, %c0_39, %c24] : memref<1x56x32xf32, #tpu.memory_space<vmem>>, vector<1x56x8xf32>
    tpu.vector_store %arg8[%c0_38, %c0_39, %c24], %86 {strides = array<i32>} : memref<1x56x32xf32, #tpu.memory_space<vmem>>, vector<1x56x8xf32>,
    %c0_40 = arith.constant 0 : index
    %c0_41 = arith.constant 0 : index
    %c0_42 = arith.constant 0 : index
    %88 = vector.load %arg8[%c0_40, %c0_41, %c0_42] : memref<1x56x32xf32, #tpu.memory_space<vmem>>, vector<1x56x32xf32>
    %89 = vector.shape_cast %88 : vector<1x56x32xf32> to vector<56x32xf32>
    %c0_43 = arith.constant 0 : index
    %c0_44 = arith.constant 0 : index
    %90 = vector.load %arg5[%c0_43, %c0_44] : memref<32x128xf32, #tpu.memory_space<vmem>>, vector<32x128xf32>
    %cst_45 = arith.constant dense<0.000000e+00> : vector<56x128xf32>
    %91 = tpu.matmul %89, %90, %cst_45 {dimension_numbers = #tpu.dot_dimension_numbers<[1], [0], [0], [1], [0, 0, 1, 1], [], []>} : vector<56x32xf32>, vector<32x128xf32>, vector<56x128xf32> -> vector<56x128xf32>
    %c0_46 = arith.constant 0 : index
    %c0_47 = arith.constant 0 : index
    %92 = vector.load %arg6[%c0_46, %c0_47] : memref<1x128xf32, #tpu.memory_space<vmem>>, vector<1x128xf32>
    %93 = vector.broadcast %92 : vector<1x128xf32> to vector<56x128xf32>
    %94 = arith.addf %91, %93 : vector<56x128xf32>
    %95 = vector.shape_cast %94 : vector<56x128xf32> to vector<1x56x128xf32>
    %c0_48 = arith.constant 0 : index
    %c0_49 = arith.constant 0 : index
    %c0_50 = arith.constant 0 : index
    %96 = vector.load %arg7[%c0_48, %c0_49, %c0_50] : memref<1x56x128xf32, #tpu.memory_space<vmem>>, vector<1x56x128xf32>
    tpu.vector_store %arg7[%c0_48, %c0_49, %c0_50], %95 {strides = array<i32>} : memref<1x56x128xf32, #tpu.memory_space<vmem>>, vector<1x56x128xf32>,
    return
  }
  func.func @transform_0(%arg0: i32) -> (i32, i32, i32) {
    %c0_i32 = arith.constant 0 : i32
    %c0_i32_0 = arith.constant 0 : i32
    %c0_i32_1 = arith.constant 0 : i32
    return %arg0, %c0_i32, %c0_i32_0 : i32, i32, i32
  }
  func.func @transform_1(%arg0: i32) -> (i32, i32) {
    %c0_i32 = arith.constant 0 : i32
    %c0_i32_0 = arith.constant 0 : i32
    %c0_i32_1 = arith.constant 0 : i32
    return %c0_i32, %c0_i32_0 : i32, i32
  }
  func.func @transform_2(%arg0: i32) -> (i32, i32) {
    %c0_i32 = arith.constant 0 : i32
    %c0_i32_0 = arith.constant 0 : i32
    %c0_i32_1 = arith.constant 0 : i32
    return %c0_i32, %c0_i32_0 : i32, i32
  }
  func.func @transform_3(%arg0: i32) -> (i32, i32, i32) {
    %c0_i32 = arith.constant 0 : i32
    %c0_i32_0 = arith.constant 0 : i32
    %c0_i32_1 = arith.constant 0 : i32
    %c0_i32_2 = arith.constant 0 : i32
    return %c0_i32, %c0_i32_0, %c0_i32_1 : i32, i32, i32
  }
  func.func @transform_4(%arg0: i32) -> (i32, i32) {
    %c0_i32 = arith.constant 0 : i32
    %c0_i32_0 = arith.constant 0 : i32
    %c0_i32_1 = arith.constant 0 : i32
    return %c0_i32, %c0_i32_0 : i32, i32
  }
  func.func @transform_5(%arg0: i32) -> (i32, i32) {
    %c0_i32 = arith.constant 0 : i32
    %c0_i32_0 = arith.constant 0 : i32
    %c0_i32_1 = arith.constant 0 : i32
    return %c0_i32, %c0_i32_0 : i32, i32
  }
  func.func @transform_6(%arg0: i32) -> (i32, i32, i32) {
    %c0_i32 = arith.constant 0 : i32
    %c0_i32_0 = arith.constant 0 : i32
    %c0_i32_1 = arith.constant 0 : i32
    return %arg0, %c0_i32, %c0_i32_0 : i32, i32, i32
  }
}

</mosaic_0001>

<bundles_post_ra>
// kernel: tpu_custom_call.1
= control target key start
LH: loop header
LB: loop body
LE: loop exit
PB: predicated region body
PF: predicated region fallthrough
CT: control target
= control target key end

     0   :  { %11 = vsyncpa [#allocation4], 0  ;;  %s4368_s0 = inlined_call_operand.vmem [shape: f32[2,56,32], index: 0, kind: input, shape index: {}]   ;;  %s4369_s1 = inlined_call_operand.vmem [shape: f32[32,96], index: 1, kind: input, shape index: {}]   ;;  %s4370_s2 = inlined_call_operand.vmem [shape: f32[1,96], index: 2, kind: input, shape index: {}]   ;;  %s4371_s3 = inlined_call_operand.hbm [shape: f32[4,56,56], index: 3, kind: input, shape index: {}]   ;;  %s4372_s4 = inlined_call_operand.vmem [shape: f32[32,128], index: 4, kind: input, shape index: {}]   ;;  %s4373_s5 = inlined_call_operand.vmem [shape: f32[1,128], index: 5, kind: input, shape index: {}]   ;;  %s4374_s6 = inlined_call_operand.hbm [shape: f32[2,56,128], index: 6, kind: output, shape index: {}]  }
   0x1   :  { %12 = vsyncpa [#allocation5], 0 }
   0x2   :  { %14 = vsyncpa [#allocation5 + $0x1], 0  ;;  %s3420_s21 = smov 0   ;;  %s3422_s22 = smov 0  }
   0x3   :  { %s3424_s23 = smov 0   ;;  %s3426_s24 = smov 0  }
   0x4 LB: > { %s3441_s25 = sadd.s32 4294967295, %s3361_s24   ;;  %s2280_s26 = sadd.s32 4294967294, %s3361_s24   ;;  %s3361_s24 = sphi %s3426_s24, %s4392_s24   ;;  %s3357_s23 = sphi %s3424_s23, %s4391_s23   ;;  %s3353_s22 = sphi %s3422_s22, %s4390_s22   ;;  %s3349_s21 = sphi %s3420_s21, %s4389_s21  }
   0x5   : > { %s3445_s27 = sadd.s32 1, %s3361_s24   ;;  %s158_s28 = sadd.s32 1, %s3357_s23 }
   0x6   : > { %s155_s29 = ssub.s32 %s3361_s24, %s3445_s27  ;;  %p168_p0 = scmp.ne.s32.totalorder %s3357_s23, %s3353_s22 }
   0x7   : > { %p156_p1 = scmp.eq.s32.totalorder %s155_s29, 0  ;;  %p169_p2 = scmp.eq.s32.totalorder %s3441_s25, 1 }
   0x8   : > { %p174_p3 = scmp.ne.s32.totalorder %s3353_s22, %s3349_s21  ;;  %p175_p4 = scmp.eq.s32.totalorder %s2280_s26, 1 }
   0x9   : > { %s3456_s30 = scalar_select %p156_p1, %s3357_s23, %s158_s28  }
   0xa   : > { %p3458_p5 = por %p169_p2, %p168_p0  ;;  %p3462_p6 = por %p175_p4, %p174_p3 }
   0xb   : > { %p2281_p7 = scmp.ge.s32.totalorder %s3361_s24, 1  ;;  %p182_p8 = scmp.lt.s32.totalorder %s3361_s24, 3 }
   0xc   : > { %s4378_s7 = scalar_select %p3458_p5, 1, 0 }
   0xd   : > { %s4379_s8 = scalar_select %p3462_p6, 1, 0 }
   0xe   : > { %p4375_p9 = scmp.eq.s32.totalorder %s3441_s25, 0  ;;  %p3469_p10 = pnand %p2281_p7, %p182_p8 }
   0xf   : > { %s3363_s10 = smov [#allocation3]   ;;  %s3267_s15 = scalar_lea.hbm %s4371_s3, 3584 }
  0x10   : > { %s4380_s9 = scalar_select %p3469_p10, 1, 0 }
  0x11   : > { %s200_s11 = sshll.u32 %s3363_s10, 4  ;;  %p2971_p11 = pneg %p3469_p10  ;;  %s201_s11 = int_to_ptr.vmem [resolvable:$true] %s200_s11 }
  0x12   : > { %p3268_p13 = scmp.ne.s32.totalorder %s4371_s3, %s3267_s15  ;;  %p3274_p3 = scmp.lt.u32.totalorder %s3267_s15, %s4371_s3 }
  0x13   : > { %p3477_p12 = pnand %p4375_p9, %p2971_p11 }
  0x15   : > { %p3269_p0 = pneg %p3477_p12 }
  0x17   : > { %p3270_p1 = pnand %p3269_p0, %p3268_p13 }
  0x19   : > { %p3271_p2 = pneg %p3270_p1 }
  0x1b   : > { %p3276_p4 = pnand %p3274_p3, %p3271_p2 }
  0x1d   : > { %3279 = shalt.err (!%p3276_p4)
}
  0x1e   : > { %s3280_s20 = scalar_lea.vmem %s201_s11, 3584  ;;  %p3288_p9 = scmp.lt.s32.totalorder %s201_s11, %s201_s11 }
  0x1f   : > { %p3281_p7 = scmp.ne.s32.totalorder %s201_s11, %s3280_s20  ;;  %p3289_p6 = scmp.lt.s32.totalorder %s3280_s20, %s3280_s20 }
  0x21   : > { %p3283_p8 = pnand %p3281_p7, %p3269_p0  ;;  %p3290_p5 = por %p3289_p6, %p3288_p9 }
  0x23   : > { %p3284_p11 = pneg %p3283_p8 }
  0x25   : > { %p3291_p10 = pnand %p3290_p5, %p3284_p11 }
  0x27   : > { %3294 = shalt.err (!%p3291_p10)
}
  0x28   : > { %s3364_s26 = smov 128   ;;  %s3365_s28 = smov 8  }
  0x29   : > { %2974 = dma.hbm_to_vmem [thread:$0]  (!%p3477_p12), %s4371_s3, 3584, %s201_s11, [#allocation4], %s3364_s26, %s3364_s26, %s3365_s28  }
  0x2a   : > { %p4382_p13 = scmp.ne.s32.totalorder %s4380_s9, 0 }
  0x2b   : > { %p4383_p1 = scmp.eq.s32.totalorder (!%p4382_p13), %s3441_s25, 0 }
  0x2c   : > { %230 = sbr.rel (%p4382_p13) target bundleno = 1519 (0x5ef), region = 44 }
  0x33   : > { %3340 = dma.done.wait (%p4383_p1), [#allocation4], 3584   ;;  %p4384_p0 = pmov %p4383_p1 }
  0x34   : > { %p260_p5 = scmp.lt.s32.totalorder %s3441_s25, 1  ;;  %v3366_v0 = vmov 0.0|0.0   ;;  %vm3367_vm0 = vmmov 0   ;;  %v3368_v1 = vmov 0.0   ;;  %v272_v2 = vld [vmem:[%s4369_s1] sm:$0xff]  ;;  %v273_v3 = vld [vmem:[%s4369_s1 + $0x8] sm:$0xff] }
  0x35   : > { %3342 = vsyncadd (%p4384_p0), [#allocation4], 4294963712  ;;  %2862 = vmatprep.subr.bf16.mxu0 %v3366_v0  ;;  %2532 = vmatprep.mubr.msk.f32.mxu0 %vm3367_vm0, %v3368_v1  ;;  %v274_v4 = vld [vmem:[%s4369_s1 + $0x10] sm:$0xff]  ;;  %v2863_v5 = vpack.c.bf16 %v273_v3, %v272_v2  ;;  %v275_v6 = vld [vmem:[%s4369_s1 + $0x18] sm:$0xff]  ;;  %vm283_vm1 = vcmask 261120   ;;  %s3370_s11 = smov 88  }
  0x36   : > { %2868 = vmatprep.subr.bf16.mxu1 %v3366_v0  ;;  %2567 = vmatprep.mubr.msk.f32.mxu1 %vm3367_vm0, %v3368_v1  ;;  %s261_s9 = scalar_select %p260_p5, %s3441_s25, 1  ;;  %v2866_v7 = vpack.c.bf16 %v275_v6, %v274_v4  ;;  %v2287_v17 = vld [vmem:[%s4370_s2] ss:$0 sm:$0xff]  ;;  %vm433_vm2 = vcmask 64512   ;;  %v405_v43 = vld [vmem:[#allocation3] sm:$0xff]  ;;  %vm562_vm4 = vcmask 457728  }
  0x37   : > { %2864 = vmatpush3.bf16.msra.mxu0 %v2863_v5  ;;  %s3371_s12 = smov 80   ;;  %s3372_s13 = smov 120   ;;  %vm3631_vm3 = vmpackc.low %vm433_vm2, %vm433_vm2  ;;  %vm1200_vm5 = vcmask 130112   ;;  %vm1619_vm6 = vcmask 195712   ;;  %vm2038_vm7 = vcmask 261312  }
  0x38   : > { %s2963_s17 = smul.u32 56, %s261_s9  ;;  %2865 = vmatprep.subr.bf16.mxu0 %v3366_v0  ;;  %s3369_s9 = smov 96  }
  0x39   : > { %s3373_s14 = smov 112   ;;  %s3374_s15 = smov 72  }
  0x3a   : > { %s264_s28 = scalar_lea.vmem %s4368_s0, %s2963_s17  ;;  %s3375_s16 = smov 104  }
  0x3b   : > { %2867 = vmatpush3.bf16.msra.mxu0 %v2866_v7  ;;  %v265_v8 = vld [vmem:[%s264_s28] sm:$0xff]  ;;  %v266_v9 = vld [vmem:[%s264_s28 + $0x8] sm:$0xff]  ;;  %v267_v10 = vld [vmem:[%s264_s28 + $0x10] sm:$0xff]  ;;  %s3376_s17 = smov 64   ;;  %s3377_s18 = smov 56  }
  0x3c   : > { %2880 = vmatprep.subr.bf16.mxu0 %v3366_v0  ;;  %v268_v11 = vld [vmem:[%s264_s28 + $0x18] sm:$0xff]  ;;  %v269_v12 = vld [vmem:[%s264_s28 + $0x20] sm:$0xff]  ;;  %v270_v13 = vld [vmem:[%s264_s28 + $0x28] sm:$0xff]  ;;  %s3378_s19 = smov 48   ;;  %s3379_s20 = smov 40  }
  0x3d   : > { %v271_v14 = vld [vmem:[%s264_s28 + $0x30] sm:$0xff]  ;;  %s3380_s26 = smov 8   ;;  %s3381_s28 = smov 16  }
  0x3e   : > { %2533 = vmatmul.mubr.msk.f32.vlgmr.msra.gmra.mrb[0].mxu0 %vm283_vm1, %v265_v8  ;;  %s2964_s10 = smul.u32 896, %s3441_s25  ;;  %p4387_p9 = scmp.ne.s32.totalorder %s4378_s7, 0 }
  0x3f   : > { %2535 = vmatprep.mubr.msk.f32.mxu0 %vm3367_vm0, %v3368_v1  ;;  %s3383_s25 = smov [#allocation6]  }
  0x42   : > { %2536 = vmatmul.mubr.msk.f32.gmra.mrb[2].mxu0 %vm283_vm1, %v266_v9 }
  0x43   : > { %2538 = vmatprep.mubr.msk.f32.mxu0 %vm3367_vm0, %v3368_v1 }
  0x46   : > { %2539 = vmatmul.mubr.msk.f32.gmra.mrb[4].mxu0 %vm283_vm1, %v267_v10 }
  0x47   : > { %2541 = vmatprep.mubr.msk.f32.mxu0 %vm3367_vm0, %v3368_v1 }
  0x4a   : > { %2542 = vmatmul.mubr.msk.f32.gmra.mrb[6].mxu0 %vm283_vm1, %v268_v11 }
  0x4b   : > { %2544 = vmatprep.mubr.msk.f32.mxu0 %vm3367_vm0, %v3368_v1 }
  0x4e   : > { %2545 = vmatmul.mubr.msk.f32.gmra.mrb[8].mxu0 %vm283_vm1, %v269_v12 }
  0x4f   : > { %2547 = vmatprep.mubr.msk.f32.mxu0 %vm3367_vm0, %v3368_v1 }
  0x52   : > { %2548 = vmatmul.mubr.msk.f32.gmra.mrb[10].mxu0 %vm283_vm1, %v270_v13 }
  0x53   : > { %2550 = vmatprep.mubr.msk.f32.mxu0 %vm3367_vm0, %v3368_v1 }
  0x56   : > { %2551 = vmatmul.mubr.msk.f32.gmra.mrb[12].mxu0 %vm283_vm1, %v271_v14 }
  0x57   : > { %2602 = vmatprep.mubr.msk.f32.mxu0 %vm3367_vm0, %v3368_v1 }
 0x111   : > { %v371_v15 = vpop.f32.mrb[0].mxu0 }
 0x112   : > { %v2534_v16 = vpop.f32.mrb[1].mxu0  ;;  %v3552_v19 = vadd.f32 %v2287_v17, %v371_v15 }
 0x115   : > { %v376_v18 = vpop.f32.mrb[2].mxu0 }
 0x116   : > { %v3554_v20 = vadd.f32 %v2287_v17, %v376_v18  ;;  %v2537_v21 = vpop.f32.mrb[3].mxu0 }
 0x118   : > { %v3558_v22 = vpack.i.bf16 %v3554_v20, %v3552_v19 }
 0x119   : > { %v381_v23 = vpop.f32.mrb[4].mxu0 }
 0x11a   : > { %3036 = vrot.lane.b32.xlu0 %v3558_v22, %s3369_s9  ;;  %v2540_v24 = vpop.f32.mrb[5].mxu0  ;;  %v3561_v26 = vadd.f32 %v2287_v17, %v381_v23 }
 0x11d   : > { %v386_v25 = vpop.f32.mrb[6].mxu0 }
 0x11e   : > { %v3563_v27 = vadd.f32 %v2287_v17, %v386_v25  ;;  %v2543_v28 = vpop.f32.mrb[7].mxu0 }
 0x120   : > { %v3567_v29 = vpack.i.bf16 %v3563_v27, %v3561_v26 }
 0x121   : > { %v391_v30 = vpop.f32.mrb[8].mxu0 }
 0x122   : > { %3041 = vrot.lane.b32.xlu0 %v3567_v29, %s3369_s9  ;;  %v2546_v31 = vpop.f32.mrb[9].mxu0  ;;  %v3570_v33 = vadd.f32 %v2287_v17, %v391_v30 }
 0x125   : > { %v396_v32 = vpop.f32.mrb[10].mxu0 }
 0x126   : > { %v3572_v34 = vadd.f32 %v2287_v17, %v396_v32  ;;  %3051 = vrot.lane.b32.xlu0 %v3558_v22, %s3370_s11  ;;  %v2549_v35 = vpop.f32.mrb[11].mxu0 }
 0x128   : > { %v3577_v36 = vpack.i.bf16 %v3572_v34, %v3570_v33 }
 0x129   : > { %v401_v37 = vpop.f32.mrb[12].mxu0 }
 0x12a   : > { %3061 = vrot.lane.b32.xlu0 %v3577_v36, %s3370_s11  ;;  %3046 = vrot.lane.b32.xlu1 %v3577_v36, %s3369_s9  ;;  %v3581_v38 = vadd.f32 %v2287_v17, %v401_v37  ;;  %v2552_v39 = vpop.f32.mrb[13].mxu0 }
 0x12e   : > { %3066 = vrot.lane.b32.xlu0 %v3558_v22, %s3371_s12  ;;  %431 = vrot.lane.b32.xlu1 %v3581_v38, %s3369_s9 }
 0x132   : > { %799 = vrot.lane.b32.xlu0 %v3554_v20, %s3372_s13  ;;  %3056 = vrot.lane.b32.xlu1 %v3567_v29, %s3370_s11 }
 0x136   : > { %801 = vrot.lane.b32.xlu0 %v3561_v26, %s3372_s13  ;;  %823 = vrot.lane.b32.xlu1 %v3581_v38, %s3370_s11 }
 0x13a   : > { %3076 = vrot.lane.b32.xlu0 %v3577_v36, %s3371_s12  ;;  %797 = vrot.lane.b32.xlu1 %v3552_v19, %s3372_s13 }
 0x13e   : > { %807 = vrot.lane.b32.xlu0 %v3572_v34, %s3372_s13  ;;  %3071 = vrot.lane.b32.xlu1 %v3567_v29, %s3371_s12 }
 0x142   : > { %1242 = vrot.lane.b32.xlu0 %v3581_v38, %s3371_s12  ;;  %803 = vrot.lane.b32.xlu1 %v3563_v27, %s3372_s13  ;;  %s4321_s12 = scalar_lea.hbm %s4374_s6, %s2964_s10 }
 0x146   : > { %1216 = vrot.lane.b32.xlu0 %v3552_v19, %s3373_s14  ;;  %805 = vrot.lane.b32.xlu1 %v3570_v33, %s3372_s13 }
 0x14a   : > { %3086 = vrot.lane.b32.xlu0 %v3567_v29, %s3374_s15  ;;  %809 = vrot.lane.b32.xlu1 %v3581_v38, %s3372_s13 }
 0x14e   : > { %1222 = vrot.lane.b32.xlu0 %v3563_v27, %s3373_s14  ;;  %3081 = vrot.lane.b32.xlu1 %v3558_v22, %s3374_s15 }
 0x152   : > { %1224 = vrot.lane.b32.xlu0 %v3570_v33, %s3373_s14  ;;  %1218 = vrot.lane.b32.xlu1 %v3554_v20, %s3373_s14 }
 0x156   : > { %1228 = vrot.lane.b32.xlu0 %v3581_v38, %s3373_s14  ;;  %1220 = vrot.lane.b32.xlu1 %v3561_v26, %s3373_s14 }
 0x15a   : > { %1635 = vrot.lane.b32.xlu0 %v3552_v19, %s3375_s16  ;;  %3091 = vrot.lane.b32.xlu1 %v3577_v36, %s3374_s15 }
 0x15e   : > { %1639 = vrot.lane.b32.xlu0 %v3561_v26, %s3375_s16  ;;  %1226 = vrot.lane.b32.xlu1 %v3572_v34, %s3373_s14 }
 0x162   : > { %1643 = vrot.lane.b32.xlu0 %v3570_v33, %s3375_s16  ;;  %1661 = vrot.lane.b32.xlu1 %v3581_v38, %s3374_s15  ;;  %s3299_s15 = sshll.u32 %s3383_s25, 4  ;;  %s3300_s15 = int_to_ptr.vmem [resolvable:$false] %s3299_s15 }
 0x166   : > { %1647 = vrot.lane.b32.xlu0 %v3581_v38, %s3375_s16  ;;  %1637 = vrot.lane.b32.xlu1 %v3554_v20, %s3375_s16 }
 0x16a   : > { %3096 = vrot.lane.b32.xlu0 %v3558_v22, %s3376_s17  ;;  %1641 = vrot.lane.b32.xlu1 %v3563_v27, %s3375_s16 }
 0x16e   : > { %3111 = vrot.lane.b32.xlu0 %v3558_v22, %s3377_s18  ;;  %1645 = vrot.lane.b32.xlu1 %v3572_v34, %s3375_s16  ;;  %s3382_s16 = smov 24  }
 0x172   : > { %3116 = vrot.lane.b32.xlu0 %v3567_v29, %s3377_s18  ;;  %3101 = vrot.lane.b32.xlu1 %v3567_v29, %s3376_s17 }
 0x176   : > { %3121 = vrot.lane.b32.xlu0 %v3577_v36, %s3377_s18  ;;  %3106 = vrot.lane.b32.xlu1 %v3577_v36, %s3376_s17 }
 0x17a   : > { %3131 = vrot.lane.b32.xlu0 %v3567_v29, %s3378_s19  ;;  %3126 = vrot.lane.b32.xlu1 %v3558_v22, %s3378_s19 }
 0x17e   : > { %645 = vrot.lane.b32.xlu0 %v3581_v38, %s3376_s17  ;;  %3136 = vrot.lane.b32.xlu1 %v3577_v36, %s3378_s19  ;;  %s257_s17 = sand.u32 1, %s3353_s22  }
 0x17f   : > { %s4326_s13 = scalar_lea.sflag [#allocation5], %s257_s17 }
 0x182   : > { %1035 = vrot.lane.b32.xlu0 %v3581_v38, %s3377_s18  ;;  %3141 = vrot.lane.b32.xlu1 %v3558_v22, %s3379_s20  ;;  %s2962_s18 = smul.u32 56, %s257_s17 }
 0x186   : > { %1454 = vrot.lane.b32.xlu0 %v3581_v38, %s3378_s19 }
 0x18c   : > { %v3037_v40 = vpop.permute.xlu0 %3036 }
 0x18d   : > { %v3039_v41 = vunpack.i.h.bf16 %v3037_v40  ;;  %v3038_v42 = vunpack.i.l.bf16 %v3037_v40 }
 0x18f   : > { %v2869_v44 = vpack.c.bf16 %v3039_v41, %v3038_v42 }
 0x191   : > { %2871 = vmatpush3.bf16.xpose.msk.msra.mxu1 %vm3631_vm3, %v2869_v44 }
 0x192   : > { %2872 = vmatprep.subr.bf16.mxu1 %v3366_v0 }
 0x194   : > { %v3042_v45 = vpop.permute.xlu0 %3041 }
 0x195   : > { %v3044_v46 = vunpack.i.h.bf16 %v3042_v45  ;;  %v3043_v47 = vunpack.i.l.bf16 %v3042_v45 }
 0x197   : > { %v2873_v48 = vpack.c.bf16 %v3044_v46, %v3043_v47 }
 0x198   : > { %v3052_v49 = vpop.permute.xlu0 %3051 }
 0x199   : > { %2875 = vmatpush3.bf16.xpose.msk.msra.mxu1 %vm3631_vm3, %v2873_v48  ;;  %v3054_v59 = vunpack.i.h.bf16 %v3052_v49  ;;  %v3053_v60 = vunpack.i.l.bf16 %v3052_v49 }
 0x19a   : > { %2876 = vmatprep.subr.bf16.mxu1 %v3366_v0 }
 0x19b   : > { %v2890_v63 = vpack.c.bf16 %v3054_v59, %v3053_v60 }
 0x19c   : > { %v3062_v50 = vpop.permute.xlu0 %3061  ;;  %v3047_v51 = vpop.permute.xlu1 %3046 }
 0x19d   : > { %v3049_v52 = vunpack.i.h.bf16 %v3047_v51  ;;  %v3048_v53 = vunpack.i.l.bf16 %v3047_v51  ;;  %v3064_v11 = vunpack.i.h.bf16 %v3062_v50  ;;  %v3063_v12 = vunpack.i.l.bf16 %v3062_v50 }
 0x19f   : > { %v2877_v54 = vpack.c.bf16 %v3049_v52, %v3048_v53  ;;  %v2898_v15 = vpack.c.bf16 %v3064_v11, %v3063_v12 }
 0x1a0   : > { %v3067_v55 = vpop.permute.xlu0 %3066  ;;  %v432_v56 = vpop.permute.xlu1 %431 }
 0x1a1   : > { %2879 = vmatpush3.bf16.xpose.msk.msra.mxu1 %vm3631_vm3, %v2877_v54  ;;  %v3068_v21 = vunpack.i.l.bf16 %v3067_v55 }
 0x1a2   : > { %2565 = vmatprep.subr.mxu1 %v3368_v1 }
 0x1a4   : > { %v3644_v57 = vpop.permute.xlu0 %799  ;;  %v3057_v58 = vpop.permute.xlu1 %3056 }
 0x1a5   : > { %v3059_v4 = vunpack.i.h.bf16 %v3057_v58  ;;  %v3058_v5 = vunpack.i.l.bf16 %v3057_v58 }
 0x1a7   : > { %v2894_v8 = vpack.c.bf16 %v3059_v4, %v3058_v5 }
 0x1a8   : > { %v3646_v61 = vpop.permute.xlu0 %801  ;;  %v824_v62 = vpop.permute.xlu1 %823 }
 0x1a9   : > { %2566 = vmatpush3.xpose.msk.msra.mxu1 %vm433_vm2, %v432_v56 }
 0x1aa   : > { %2889 = vmatprep.subr.bf16.mxu1 %v3366_v0 }
 0x1ac   : > { %v3650_v2 = vpop.permute.xlu0 %3076  ;;  %2568 = vmatmul.mubr.msk.f32.vlgmr.msra.gmra.mrb[0].mxu1 %vm433_vm2, %v3552_v19  ;;  %v798_v3 = vpop.permute.xlu1 %797 }
 0x1ad   : > { %2892 = vmatpush3.bf16.xpose.msk.msra.mxu1 %vm3631_vm3, %v2890_v63  ;;  %2570 = vmatprep.mubr.msk.f32.mxu1 %vm3367_vm0, %v3368_v1  ;;  %v3079_v35 = vunpack.i.h.bf16 %v3650_v2  ;;  %v3078_v37 = vunpack.i.l.bf16 %v3650_v2 }
 0x1ae   : > { %2893 = vmatprep.subr.bf16.mxu1 %v3366_v0 }
 0x1af   : > { %v2919_v41 = vpack.c.bf16 %v3079_v35, %v3078_v37  ;;  %v410_v35 = vld [vmem:[#allocation3 + $0x28] sm:$0xff] }
 0x1b0   : > { %v3659_v6 = vpop.permute.xlu0 %807  ;;  %2571 = vmatmul.mubr.msk.f32.gmra.mrb[2].mxu1 %vm433_vm2, %v3554_v20  ;;  %v3072_v7 = vpop.permute.xlu1 %3071  ;;  %v3069_v20 = vunpack.i.h.bf16 %v3067_v55 }
 0x1b1   : > { %2573 = vmatprep.mubr.msk.f32.mxu1 %vm3367_vm0, %v3368_v1  ;;  %v3073_v28 = vunpack.i.l.bf16 %v3072_v7 }
 0x1b2   : > { %v2911_v24 = vpack.c.bf16 %v3069_v20, %v3068_v21 }
 0x1b4   : > { %v3665_v9 = vpop.permute.xlu0 %1242  ;;  %2574 = vmatmul.mubr.msk.f32.gmra.mrb[4].mxu1 %vm433_vm2, %v3561_v26  ;;  %v804_v10 = vpop.permute.xlu1 %803 }
 0x1b5   : > { %2896 = vmatpush3.bf16.xpose.msk.msra.mxu1 %vm3631_vm3, %v2894_v8  ;;  %2576 = vmatprep.mubr.msk.f32.mxu1 %vm3367_vm0, %v3368_v1 }
 0x1b6   : > { %2897 = vmatprep.subr.bf16.mxu1 %v3366_v0 }
 0x1b8   : > { %v3674_v13 = vpop.permute.xlu0 %1216  ;;  %2577 = vmatmul.mubr.msk.f32.gmra.mrb[6].mxu1 %vm433_vm2, %v3563_v27  ;;  %v806_v14 = vpop.permute.xlu1 %805  ;;  %v3074_v27 = vunpack.i.h.bf16 %v3072_v7 }
 0x1b9   : > { %2579 = vmatprep.mubr.msk.f32.mxu1 %vm3367_vm0, %v3368_v1 }
 0x1ba   : > { %v2915_v32 = vpack.c.bf16 %v3074_v27, %v3073_v28 }
 0x1bc   : > { %v3680_v16 = vpop.permute.xlu0 %3086  ;;  %2580 = vmatmul.mubr.msk.f32.gmra.mrb[8].mxu1 %vm433_vm2, %v3570_v33  ;;  %v810_v17 = vpop.permute.xlu1 %809 }
 0x1bd   : > { %2900 = vmatpush3.bf16.xpose.msk.msra.mxu1 %vm3631_vm3, %v2898_v15  ;;  %2582 = vmatprep.mubr.msk.f32.mxu1 %vm3367_vm0, %v3368_v1  ;;  %v3089_v59 = vunpack.i.h.bf16 %v3680_v16  ;;  %v3088_v60 = vunpack.i.l.bf16 %v3680_v16 }
 0x1be   : > { %2635 = vmatprep.subr.mxu1 %v3368_v1 }
 0x1bf   : > { %v2936_v4 = vpack.c.bf16 %v3089_v59, %v3088_v60  ;;  %v792_v60 = vld [vmem:[#allocation3 + $0x48] sm:$0xff] }
 0x1c0   : > { %v3689_v18 = vpop.permute.xlu0 %1222  ;;  %2583 = vmatmul.mubr.msk.f32.gmra.mrb[10].mxu1 %vm433_vm2, %v3572_v34  ;;  %v3082_v19 = vpop.permute.xlu1 %3081 }
 0x1c1   : > { %2585 = vmatprep.mubr.msk.f32.mxu1 %vm3367_vm0, %v3368_v1  ;;  %v3084_v49 = vunpack.i.h.bf16 %v3082_v19  ;;  %v3083_v50 = vunpack.i.l.bf16 %v3082_v19  ;;  %v407_v19 = vld [vmem:[#allocation3 + $0x10] sm:$0xff] }
 0x1c3   : > { %v2932_v54 = vpack.c.bf16 %v3084_v49, %v3083_v50 }
 0x1c4   : > { %v3695_v22 = vpop.permute.xlu0 %1224  ;;  %2586 = vmatmul.mubr.msk.f32.gmra.mrb[12].mxu1 %vm433_vm2, %v3581_v38  ;;  %v3699_v23 = vpop.permute.xlu1 %1218 }
 0x1c5   : > { %2636 = vmatpush3.xpose.msk.msra.mxu1 %vm433_vm2, %v824_v62  ;;  %2637 = vmatprep.mubr.msk.f32.mxu1 %vm3367_vm0, %v3368_v1 }
 0x1c6   : > { %2910 = vmatprep.subr.bf16.mxu1 %v3366_v0 }
 0x1c8   : > { %v3705_v25 = vpop.permute.xlu0 %1228  ;;  %v3707_v26 = vpop.permute.xlu1 %1220  ;;  %2638 = vmatmul.mubr.msk.f32.vlgmr.msra.gmra.mrb[14].mxu1 %vm433_vm2, %v798_v3 }
 0x1c9   : > { %2913 = vmatpush3.bf16.xpose.msk.msra.mxu1 %vm3631_vm3, %v2911_v24  ;;  %2640 = vmatprep.mubr.msk.f32.mxu1 %vm3367_vm0, %v3368_v1  ;;  %v408_v24 = vld [vmem:[#allocation3 + $0x18] sm:$0xff] }
 0x1ca   : > { %2914 = vmatprep.subr.bf16.mxu1 %v3366_v0 }
 0x1cc   : > { %v3715_v30 = vpop.permute.xlu0 %1635  ;;  %v3717_v31 = vpop.permute.xlu1 %3091  ;;  %2641 = vmatmul.mubr.msk.f32.gmra.mrb[16].mxu1 %vm433_vm2, %v3644_v57 }
 0x1cd   : > { %2643 = vmatprep.mubr.msk.f32.mxu1 %vm3367_vm0, %v3368_v1  ;;  %v3094_v7 = vunpack.i.h.bf16 %v3717_v31  ;;  %v3093_v8 = vunpack.i.l.bf16 %v3717_v31 }
 0x1d0   : > { %v3723_v33 = vpop.permute.xlu0 %1639  ;;  %v3725_v34 = vpop.permute.xlu1 %1226  ;;  %2644 = vmatmul.mubr.msk.f32.gmra.mrb[18].mxu1 %vm433_vm2, %v3646_v61 }
 0x1d1   : > { %2917 = vmatpush3.bf16.xpose.msk.msra.mxu1 %vm3631_vm3, %v2915_v32  ;;  %2646 = vmatprep.mubr.msk.f32.mxu1 %vm3367_vm0, %v3368_v1 }
 0x1d2   : > { %2918 = vmatprep.subr.bf16.mxu1 %v3366_v0 }
 0x1d4   : > { %v3736_v39 = vpop.permute.xlu0 %1643  ;;  %v3738_v40 = vpop.permute.xlu1 %1661  ;;  %2647 = vmatmul.mubr.msk.f32.gmra.mrb[20].mxu1 %vm433_vm2, %v804_v10  ;;  %v2940_v10 = vpack.c.bf16 %v3094_v7, %v3093_v8 }
 0x1d5   : > { %2649 = vmatprep.mubr.msk.f32.mxu1 %vm3367_vm0, %v3368_v1 }
 0x1d8   : > { %v3743_v42 = vpop.permute.xlu0 %1647  ;;  %v3745_v44 = vpop.permute.xlu1 %1637  ;;  %2650 = vmatmul.mubr.msk.f32.gmra.mrb[22].mxu1 %vm433_vm2, %v806_v14  ;;  %v406_v14 = vld [vmem:[#allocation3 + $0x8] sm:$0xff] }
 0x1d9   : > { %2921 = vmatpush3.bf16.xpose.msk.msra.mxu1 %vm3631_vm3, %v2919_v41  ;;  %2652 = vmatprep.mubr.msk.f32.mxu1 %vm3367_vm0, %v3368_v1 }
 0x1da   : > { %2705 = vmatprep.subr.mxu1 %v3368_v1 }
 0x1dc   : > { %v3097_v45 = vpop.permute.xlu0 %3096  ;;  %v3753_v46 = vpop.permute.xlu1 %1641  ;;  %2653 = vmatmul.mubr.msk.f32.gmra.mrb[24].mxu1 %vm433_vm2, %v3659_v6 }
 0x1dd   : > { %v3099_v47 = vunpack.i.h.bf16 %v3097_v45  ;;  %v3098_v48 = vunpack.i.l.bf16 %v3097_v45  ;;  %2655 = vmatprep.mubr.msk.f32.mxu1 %vm3367_vm0, %v3368_v1 }
 0x1df   : > { %v2881_v51 = vpack.c.bf16 %v3099_v47, %v3098_v48  ;;  %v790_v48 = vld [vmem:[#allocation3 + $0x38] sm:$0xff] }
 0x1e0   : > { %v3759_v52 = vpop.permute.xlu0 %3111  ;;  %v3761_v53 = vpop.permute.xlu1 %1645  ;;  %2656 = vmatmul.mubr.msk.f32.gmra.mrb[26].mxu1 %vm433_vm2, %v810_v17 }
 0x1e1   : > { %2882 = vmatpush3.bf16.msra.mxu0 %v2881_v51  ;;  %2706 = vmatpush3.xpose.msk.msra.mxu1 %vm433_vm2, %v3665_v9 }
 0x1e2   : > { %2707 = vmatprep.mubr.msk.f32.mxu1 %vm3367_vm0, %v3368_v1  ;;  %2931 = vmatprep.subr.bf16.mxu1 %v3366_v0 }
 0x1e3   : > { %2883 = vmatprep.subr.bf16.mxu0 %v3366_v0 }
 0x1e4   : > { %v3770_v55 = vpop.permute.xlu0 %3116  ;;  %v3102_v56 = vpop.permute.xlu1 %3101  ;;  %2708 = vmatmul.mubr.msk.f32.vlgmr.msra.gmra.mrb[28].mxu1 %vm433_vm2, %v3674_v13 }
 0x1e5   : > { %v3104_v57 = vunpack.i.h.bf16 %v3102_v56  ;;  %v3103_v58 = vunpack.i.l.bf16 %v3102_v56  ;;  %2934 = vmatpush3.bf16.xpose.msk.msra.mxu1 %vm3631_vm3, %v2932_v54  ;;  %2710 = vmatprep.mubr.msk.f32.mxu1 %vm3367_vm0, %v3368_v1  ;;  %v791_v54 = vld [vmem:[#allocation3 + $0x40] sm:$0xff] }
 0x1e6   : > { %2935 = vmatprep.subr.bf16.mxu1 %v3366_v0 }
 0x1e7   : > { %v2884_v61 = vpack.c.bf16 %v3104_v57, %v3103_v58 }
 0x1e8   : > { %v3781_v62 = vpop.permute.xlu0 %3121  ;;  %v3107_v63 = vpop.permute.xlu1 %3106  ;;  %2711 = vmatmul.mubr.msk.f32.gmra.mrb[30].mxu1 %vm433_vm2, %v3699_v23 }
 0x1e9   : > { %v3109_v2 = vunpack.i.h.bf16 %v3107_v63  ;;  %v3108_v3 = vunpack.i.l.bf16 %v3107_v63  ;;  %2885 = vmatpush3.bf16.msra.mxu0 %v2884_v61  ;;  %2713 = vmatprep.mubr.msk.f32.mxu1 %vm3367_vm0, %v3368_v1 }
 0x1ea   : > { %2886 = vmatprep.subr.bf16.mxu0 %v3366_v0 }
 0x1eb   : > { %v2887_v5 = vpack.c.bf16 %v3109_v2, %v3108_v3 }
 0x1ec   : > { %v3788_v6 = vpop.permute.xlu0 %3131  ;;  %2714 = vmatmul.mubr.msk.f32.gmra.mrb[32].mxu1 %vm433_vm2, %v3707_v26 }
 0x1ed   : > { %2888 = vmatpush3.bf16.msra.mxu0 %v2887_v5  ;;  %2938 = vmatpush3.bf16.xpose.msk.msra.mxu1 %vm3631_vm3, %v2936_v4  ;;  %v793_v4 = vld [vmem:[#allocation3 + $0x50] sm:$0xff] }
 0x1ee   : > { %2716 = vmatprep.mubr.msk.f32.mxu1 %vm3367_vm0, %v3368_v1  ;;  %2600 = vmatprep.subr.mxu0 %v3368_v1 }
 0x1ef   : > { %2939 = vmatprep.subr.bf16.mxu1 %v3366_v0 }
 0x1f0   : > { %v646_v9 = vpop.permute.xlu0 %645  ;;  %2717 = vmatmul.mubr.msk.f32.gmra.mrb[34].mxu1 %vm433_vm2, %v3689_v18 }
 0x1f1   : > { %2601 = vmatpush3.msra.mxu0 %v646_v9  ;;  %2719 = vmatprep.mubr.msk.f32.mxu1 %vm3367_vm0, %v3368_v1 }
 0x1f2   : > { %2901 = vmatprep.subr.bf16.mxu0 %v3366_v0 }
 0x1f4   : > { %2720 = vmatmul.mubr.msk.f32.gmra.mrb[36].mxu1 %vm433_vm2, %v3695_v22 }
 0x1f5   : > { %2942 = vmatpush3.bf16.xpose.msk.msra.mxu1 %vm3631_vm3, %v2940_v10  ;;  %2722 = vmatprep.mubr.msk.f32.mxu1 %vm3367_vm0, %v3368_v1  ;;  %v794_v10 = vld [vmem:[#allocation3 + $0x58] sm:$0xff] }
 0x1f6   : > { %2775 = vmatprep.subr.mxu1 %v3368_v1 }
 0x1f8   : > { %2723 = vmatmul.mubr.msk.f32.gmra.mrb[38].mxu1 %vm433_vm2, %v3725_v34 }
 0x1f9   : > { %2725 = vmatprep.mubr.msk.f32.mxu1 %vm3367_vm0, %v3368_v1 }
 0x1fc   : > { %2726 = vmatmul.mubr.msk.f32.gmra.mrb[40].mxu1 %vm433_vm2, %v3705_v25 }
 0x1fd   : > { %2776 = vmatpush3.xpose.msk.msra.mxu1 %vm433_vm2, %v3738_v40  ;;  %2777 = vmatprep.mubr.msk.f32.mxu1 %vm3367_vm0, %v3368_v1 }
 0x1fe   : > { %2958 = vmatprep.subr.bf16.mxu1 %v3366_v0 }
 0x200   : > { %2778 = vmatmul.mubr.msk.f32.vlgmr.msra.gmra.mrb[42].mxu1 %vm433_vm2, %v3715_v30  ;;  %v409_v30 = vld [vmem:[#allocation3 + $0x20] sm:$0xff] }
 0x201   : > { %2780 = vmatprep.mubr.msk.f32.mxu1 %vm3367_vm0, %v3368_v1 }
 0x204   : > { %2781 = vmatmul.mubr.msk.f32.gmra.mrb[44].mxu1 %vm433_vm2, %v3745_v44 }
 0x205   : > { %2783 = vmatprep.mubr.msk.f32.mxu1 %vm3367_vm0, %v3368_v1 }
 0x208   : > { %2784 = vmatmul.mubr.msk.f32.gmra.mrb[46].mxu1 %vm433_vm2, %v3723_v33 }
 0x209   : > { %2786 = vmatprep.mubr.msk.f32.mxu1 %vm3367_vm0, %v3368_v1 }
 0x20c   : > { %2787 = vmatmul.mubr.msk.f32.gmra.mrb[48].mxu1 %vm433_vm2, %v3753_v46 }
 0x20d   : > { %2789 = vmatprep.mubr.msk.f32.mxu1 %vm3367_vm0, %v3368_v1 }
 0x210   : > { %2790 = vmatmul.mubr.msk.f32.gmra.mrb[50].mxu1 %vm433_vm2, %v3736_v39 }
 0x211   : > { %2792 = vmatprep.mubr.msk.f32.mxu1 %vm3367_vm0, %v3368_v1 }
 0x214   : > { %2793 = vmatmul.mubr.msk.f32.gmra.mrb[52].mxu1 %vm433_vm2, %v3761_v53 }
 0x215   : > { %2795 = vmatprep.mubr.msk.f32.mxu1 %vm3367_vm0, %v3368_v1 }
 0x218   : > { %2796 = vmatmul.mubr.msk.f32.gmra.mrb[54].mxu1 %vm433_vm2, %v3743_v42  ;;  %v411_v42 = vld [vmem:[#allocation3 + $0x30] sm:$0xff] }
 0x219   : > { %2847 = vmatprep.mubr.msk.f32.mxu1 %vm3367_vm0, %v3368_v1 }
 0x27f   : > { %v528_v11 = vpop.f32.mrb[0].mxu1 }
 0x280   : > { %v3851_v12 = vadd.f32 %v528_v11, %v405_v43  ;;  %v2569_v13 = vpop.f32.mrb[1].mxu1 }
 0x282   : > { %v563_v15 = vsel %vm562_vm4, %v3851_v12, -inf }
 0x283   : > { %564 = vmax.xlane.f32.xlu1 %v563_v15  ;;  %v533_v16 = vpop.f32.mrb[2].mxu1  ;;  %v795_v15 = vld [vmem:[#allocation3 + $0x60] sm:$0xff] }
 0x284   : > { %v3855_v17 = vadd.f32 %v533_v16, %v406_v14  ;;  %v2572_v18 = vpop.f32.mrb[3].mxu1 }
 0x286   : > { %v566_v20 = vsel %vm562_vm4, %v3855_v17, -inf }
 0x287   : > { %567 = vmax.xlane.f32.xlu0 %v566_v20  ;;  %v538_v21 = vpop.f32.mrb[4].mxu1 }
 0x288   : > { %v3859_v22 = vadd.f32 %v538_v21, %v407_v19  ;;  %v2575_v23 = vpop.f32.mrb[5].mxu1  ;;  %v796_v21 = vld [vmem:[#allocation3 + $0x68] sm:$0xff] }
 0x28a   : > { %v569_v25 = vsel %vm562_vm4, %v3859_v22, -inf }
 0x28b   : > { %570 = vmax.xlane.f32.xlu0 %v569_v25  ;;  %v543_v26 = vpop.f32.mrb[6].mxu1 }
 0x28c   : > { %v3863_v27 = vadd.f32 %v543_v26, %v408_v24  ;;  %v2578_v28 = vpop.f32.mrb[7].mxu1 }
 0x28d   : > { %v1209_v28 = vld [vmem:[#allocation3 + $0x70] sm:$0xff] }
 0x28e   : > { %v572_v31 = vsel %vm562_vm4, %v3863_v27, -inf }
 0x28f   : > { %573 = vmax.xlane.f32.xlu1 %v572_v31  ;;  %v548_v32 = vpop.f32.mrb[8].mxu1 }
 0x290   : > { %v3867_v33 = vadd.f32 %v548_v32, %v409_v30  ;;  %v2581_v34 = vpop.f32.mrb[9].mxu1 }
 0x292   : > { %v575_v37 = vsel %vm562_vm4, %v3867_v33, -inf }
 0x293   : > { %576 = vmax.xlane.f32.xlu1 %v575_v37  ;;  %v553_v39 = vpop.f32.mrb[10].mxu1 }
 0x294   : > { %v3871_v40 = vadd.f32 %v553_v39, %v410_v35  ;;  %v2584_v41 = vpop.f32.mrb[11].mxu1  ;;  %v1211_v39 = vld [vmem:[#allocation3 + $0x80] sm:$0xff] }
 0x296   : > { %v578_v44 = vsel %vm562_vm4, %v3871_v40, -inf }
 0x297   : > { %579 = vmax.xlane.f32.xlu0 %v578_v44  ;;  %v558_v45 = vpop.f32.mrb[12].mxu1 }
 0x298   : > { %v3875_v46 = vadd.f32 %v558_v45, %v411_v42  ;;  %v2587_v47 = vpop.f32.mrb[13].mxu1  ;;  %v1212_v45 = vld [vmem:[#allocation3 + $0x88] sm:$0xff] }
 0x29a   : > { %v581_v49 = vsel %vm562_vm4, %v3875_v46, -inf }
 0x29b   : > { %582 = vmax.xlane.f32.xlu1 %v581_v49  ;;  %v919_v50 = vpop.f32.mrb[14].mxu1  ;;  %v1210_v49 = vld [vmem:[#allocation3 + $0x78] sm:$0xff] }
 0x29c   : > { %v3879_v51 = vadd.f32 %v919_v50, %v790_v48  ;;  %v2639_v53 = vpop.f32.mrb[15].mxu1 }
 0x29e   : > { %v953_v56 = vsel %vm562_vm4, %v3879_v51, -inf }
 0x29f   : > { %954 = vmax.xlane.f32.xlu1 %v953_v56  ;;  %v924_v57 = vpop.f32.mrb[16].mxu1 }
 0x2a0   : > { %v3883_v58 = vadd.f32 %v924_v57, %v791_v54  ;;  %v2642_v59 = vpop.f32.mrb[17].mxu1  ;;  %v1213_v54 = vld [vmem:[#allocation3 + $0x90] sm:$0xff] }
 0x2a2   : > { %v956_v61 = vsel %vm562_vm4, %v3883_v58, -inf }
 0x2a3   : > { %957 = vmax.xlane.f32.xlu1 %v956_v61  ;;  %v929_v63 = vpop.f32.mrb[18].mxu1 }
 0x2a4   : > { %v3887_v2 = vadd.f32 %v929_v63, %v792_v60  ;;  %v2645_v3 = vpop.f32.mrb[19].mxu1  ;;  %v1214_v63 = vld [vmem:[#allocation3 + $0x98] sm:$0xff] }
 0x2a6   : > { %v959_v5 = vsel %vm562_vm4, %v3887_v2, -inf }
 0x2a7   : > { %960 = vmax.xlane.f32.xlu1 %v959_v5  ;;  %v934_v7 = vpop.f32.mrb[20].mxu1 }
 0x2a8   : > { %v3891_v8 = vadd.f32 %v934_v7, %v793_v4  ;;  %v2648_v9 = vpop.f32.mrb[21].mxu1 }
 0x2aa   : > { %v962_v43 = vsel %vm562_vm4, %v3891_v8, -inf }
 0x2ab   : > { %963 = vmax.xlane.f32.xlu1 %v962_v43  ;;  %v939_v11 = vpop.f32.mrb[22].mxu1 }
 0x2ac   : > { %v3895_v13 = vadd.f32 %v939_v11, %v794_v10  ;;  %v2651_v14 = vpop.f32.mrb[23].mxu1  ;;  %v1215_v10 = vld [vmem:[#allocation3 + $0xa0] sm:$0xff] }
 0x2ad   : > { %3146 = vrot.lane.b32.xlu0 %v3567_v29, %s3379_s20 }
 0x2ae   : > { %v965_v16 = vsel %vm562_vm4, %v3895_v13, -inf }
 0x2af   : > { %966 = vmax.xlane.f32.xlu1 %v965_v16  ;;  %v944_v18 = vpop.f32.mrb[24].mxu1  ;;  %v1628_v16 = vld [vmem:[#allocation3 + $0xa8] sm:$0xff] }
 0x2b0   : > { %v3901_v19 = vadd.f32 %v944_v18, %v795_v15  ;;  %v2654_v20 = vpop.f32.mrb[25].mxu1 }
 0x2b2   : > { %v968_v23 = vsel %vm562_vm4, %v3901_v19, -inf }
 0x2b3   : > { %969 = vmax.xlane.f32.xlu1 %v968_v23  ;;  %v949_v24 = vpop.f32.mrb[26].mxu1 }
 0x2b4   : > { %v3905_v25 = vadd.f32 %v949_v24, %v796_v21  ;;  %v2657_v26 = vpop.f32.mrb[27].mxu1  ;;  %v1629_v24 = vld [vmem:[#allocation3 + $0xb0] sm:$0xff] }
 0x2b6   : > { %v971_v29 = vsel %vm562_vm4, %v3905_v25, -inf }
 0x2b7   : > { %972 = vmax.xlane.f32.xlu1 %v971_v29  ;;  %v1338_v30 = vpop.f32.mrb[28].mxu1 }
 0x2b8   : > { %v3909_v31 = vadd.f32 %v1338_v30, %v1209_v28  ;;  %v2709_v32 = vpop.f32.mrb[29].mxu1 }
 0x2b9   : > { %v1630_v32 = vld [vmem:[#allocation3 + $0xb8] sm:$0xff] }
 0x2ba   : > { %v1372_v34 = vsel %vm562_vm4, %v3909_v31, -inf }
 0x2bb   : > { %1373 = vmax.xlane.f32.xlu1 %v1372_v34  ;;  %v1343_v35 = vpop.f32.mrb[30].mxu1 }
 0x2bc   : > { %v2712_v37 = vpop.f32.mrb[31].mxu1  ;;  %v3921_v57 = vadd.f32 %v1343_v35, %v1210_v49  ;;  %v1632_v49 = vld [vmem:[#allocation3 + $0xc8] sm:$0xff] }
 0x2be   : > { %v1375_v5 = vsel %vm562_vm4, %v3921_v57, -inf }
 0x2bf   : > { %v1348_v41 = vpop.f32.mrb[32].mxu1 }
 0x2c0   : > { %v3913_v42 = vadd.f32 %v1348_v41, %v1211_v39  ;;  %v2715_v44 = vpop.f32.mrb[33].mxu1  ;;  %v1631_v41 = vld [vmem:[#allocation3 + $0xc0] sm:$0xff] }
 0x2c2   : > { %v1378_v47 = vsel %vm562_vm4, %v3913_v42, -inf }
 0x2c3   : > { %1379 = vmax.xlane.f32.xlu1 %v1378_v47  ;;  %v1353_v48 = vpop.f32.mrb[34].mxu1 }
 0x2c4   : > { %v3917_v50 = vadd.f32 %v1353_v48, %v1212_v45  ;;  %v2718_v53 = vpop.f32.mrb[35].mxu1 }
 0x2c6   : > { %v1381_v56 = vsel %vm562_vm4, %v3917_v50, -inf }
 0x2c7   : > { %1382 = vmax.xlane.f32.xlu1 %v1381_v56  ;;  %v1358_v59 = vpop.f32.mrb[36].mxu1 }
 0x2c8   : > { %v3923_v60 = vadd.f32 %v1358_v59, %v1213_v54  ;;  %v2721_v61 = vpop.f32.mrb[37].mxu1 }
 0x2c9   : > { %v1633_v61 = vld [vmem:[#allocation3 + $0xd0] sm:$0xff] }
 0x2ca   : > { %v1384_v3 = vsel %vm562_vm4, %v3923_v60, -inf }
 0x2cb   : > { %1385 = vmax.xlane.f32.xlu1 %v1384_v3  ;;  %v1363_v4 = vpop.f32.mrb[38].mxu1 }
 0x2cc   : > { %v3929_v7 = vadd.f32 %v1363_v4, %v1214_v63  ;;  %1376 = vmax.xlane.f32.xlu0 %v1375_v5  ;;  %v2724_v9 = vpop.f32.mrb[39].mxu1 }
 0x2ce   : > { %v1387_v43 = vsel %vm562_vm4, %v3929_v7, -inf }
 0x2cf   : > { %v1368_v11 = vpop.f32.mrb[40].mxu1 }
 0x2d0   : > { %v3933_v14 = vadd.f32 %v1368_v11, %v1215_v10  ;;  %1388 = vmax.xlane.f32.xlu0 %v1387_v43  ;;  %v2727_v15 = vpop.f32.mrb[41].mxu1  ;;  %v3965_v11 = vpop.permute.xlu1 %3126 }
 0x2d2   : > { %v1390_v18 = vsel %vm562_vm4, %v3933_v14, -inf }
 0x2d3   : > { %1391 = vmax.xlane.f32.xlu1 %v1390_v18  ;;  %v1757_v20 = vpop.f32.mrb[42].mxu1 }
 0x2d4   : > { %v3937_v21 = vadd.f32 %v1757_v20, %v1628_v16  ;;  %v2779_v23 = vpop.f32.mrb[43].mxu1  ;;  %v3967_v15 = vpop.permute.xlu1 %3136 }
 0x2d5   : > { %v1036_v16 = vpop.permute.xlu0 %1035 }
 0x2d6   : > { %v1791_v26 = vsel %vm562_vm4, %v3937_v21, -inf }
 0x2d7   : > { %1792 = vmax.xlane.f32.xlu0 %v1791_v26  ;;  %v1762_v28 = vpop.f32.mrb[44].mxu1 }
 0x2d8   : > { %v3941_v29 = vadd.f32 %v1762_v28, %v1629_v24  ;;  %v2782_v30 = vpop.f32.mrb[45].mxu1  ;;  %v3969_v18 = vpop.permute.xlu1 %3141  ;;  %v1634_v28 = vld [vmem:[#allocation3 + $0xd8] sm:$0xff] }
 0x2d9   : > { %v3971_v20 = vpop.permute.xlu0 %1454 }
 0x2da   : > { %v1794_v34 = vsel %vm562_vm4, %v3941_v29, -inf }
 0x2db   : > { %1795 = vmax.xlane.f32.xlu1 %v1794_v34  ;;  %v1767_v35 = vpop.f32.mrb[46].mxu1 }
 0x2dc   : > { %v3945_v37 = vadd.f32 %v1767_v35, %v1630_v32  ;;  %v2785_v39 = vpop.f32.mrb[47].mxu1 }
 0x2dd   : > { %v3114_v39 = vunpack.i.h.bf16 %v3759_v52 }
 0x2de   : > { %v1797_v44 = vsel %vm562_vm4, %v3945_v37, -inf }
 0x2df   : > { %1798 = vmax.xlane.f32.xlu1 %v1797_v44  ;;  %v1772_v45 = vpop.f32.mrb[48].mxu1 }
 0x2e0   : > { %v3949_v47 = vadd.f32 %v1772_v45, %v1631_v41  ;;  %v2788_v48 = vpop.f32.mrb[49].mxu1  ;;  %v3113_v41 = vunpack.i.l.bf16 %v3759_v52 }
 0x2e2   : > { %v1800_v53 = vsel %vm562_vm4, %v3949_v47, -inf }
 0x2e3   : > { %1801 = vmax.xlane.f32.xlu1 %v1800_v53  ;;  %v1777_v54 = vpop.f32.mrb[50].mxu1  ;;  %v3119_v53 = vunpack.i.h.bf16 %v3770_v55 }
 0x2e4   : > { %v3953_v56 = vadd.f32 %v1777_v54, %v1632_v49  ;;  %v2791_v59 = vpop.f32.mrb[51].mxu1  ;;  %v2902_v49 = vpack.c.bf16 %v3114_v39, %v3113_v41  ;;  %v3128_v41 = vunpack.i.l.bf16 %v3965_v11 }
 0x2e6   : > { %v1803_v63 = vsel %vm562_vm4, %v3953_v56, -inf }
 0x2e7   : > { %1804 = vmax.xlane.f32.xlu0 %v1803_v63  ;;  %v1782_v3 = vpop.f32.mrb[52].mxu1  ;;  %v3124_v63 = vunpack.i.h.bf16 %v3781_v62 }
 0x2e8   : > { %v3957_v4 = vadd.f32 %v1782_v3, %v1633_v61  ;;  %v2794_v5 = vpop.f32.mrb[53].mxu1 }
 0x2ea   : > { %v1806_v9 = vsel %vm562_vm4, %v3957_v4, -inf }
 0x2eb   : > { %1807 = vmax.xlane.f32.xlu1 %v1806_v9  ;;  %v1787_v10 = vpop.f32.mrb[54].mxu1 }
 0x2ec   : > { %v2797_v43 = vpop.f32.mrb[55].mxu1  ;;  %v3975_v32 = vadd.f32 %v1787_v10, %v1634_v28 }
 0x2fc   : > { %1873 = vrot.lane.b32.xlu1 %v3581_v38, %s3379_s20 }
 0x2fd   : > { %3151 = vrot.lane.b32.xlu0 %v3577_v36, %s3379_s20 }
 0x310   : > { %v565_v23 = vpop.xlane.xlu1 %564 }
 0x311   : > { %v584_v24 = vsub.f32 %v3851_v12, %v565_v23  ;;  %v1809_v12 = vsel %vm562_vm4, %v3975_v32, -inf }
 0x313   : > { %v591_v26 = vmul.f32 1.442695, %v584_v24 }
 0x314   : > { %v568_v30 = vpop.xlane.xlu0 %567 }
 0x315   : > { %3155 = vpow2.f32 %v591_v26  ;;  %v585_v38 = vsub.f32 %v3855_v17, %v568_v30 }
 0x317   : > { %v593_v36 = vmul.f32 1.442695, %v585_v38 }
 0x318   : > { %v571_v34 = vpop.xlane.xlu0 %570 }
 0x319   : > { %3157 = vpow2.f32 %v593_v36  ;;  %v586_v35 = vsub.f32 %v3859_v22, %v571_v34  ;;  %v3118_v22 = vunpack.i.l.bf16 %v3770_v55  ;;  %v3123_v55 = vunpack.i.l.bf16 %v3781_v62 }
 0x31b   : > { %v595_v44 = vmul.f32 1.442695, %v586_v35  ;;  %v2905_v61 = vpack.c.bf16 %v3119_v53, %v3118_v22  ;;  %v2908_v10 = vpack.c.bf16 %v3124_v63, %v3123_v55 }
 0x31c   : > { %v574_v45 = vpop.xlane.xlu1 %573  ;;  %1810 = vmax.xlane.f32.xlu0 %v1809_v12 }
 0x31d   : > { %3159 = vpow2.f32 %v595_v44  ;;  %v587_v17 = vsub.f32 %v3863_v27, %v574_v45 }
 0x31f   : > { %v3983_v48 = vpop.eup %3155  ;;  %v597_v54 = vmul.f32 1.442695, %v587_v17  ;;  %v3134_v17 = vunpack.i.h.bf16 %v3788_v6 }
 0x320   : > { %v577_v59 = vpop.xlane.xlu1 %576  ;;  %2603 = vmatmul.mubr.msk.f32.vlgmr.msra.gmra.mrb[14].mxu0 %vm562_vm4, %v3983_v48 }
 0x321   : > { %3161 = vpow2.f32 %v597_v54  ;;  %v588_v52 = vsub.f32 %v3867_v33, %v577_v59  ;;  %2903 = vmatpush3.bf16.msra.mxu0 %v2902_v49  ;;  %2605 = vmatprep.mubr.msk.f32.mxu0 %vm3367_vm0, %v3368_v1  ;;  %v3133_v49 = vunpack.i.l.bf16 %v3788_v6  ;;  %v3139_v6 = vunpack.i.h.bf16 %v3967_v15 }
 0x322   : > { %2904 = vmatprep.subr.bf16.mxu0 %v3366_v0 }
 0x323   : > { %v3993_v27 = vpop.eup %3157  ;;  %v599_v3 = vmul.f32 1.442695, %v588_v52  ;;  %v2926_v52 = vpack.c.bf16 %v3134_v17, %v3133_v49 }
 0x324   : > { %v580_v5 = vpop.xlane.xlu0 %579  ;;  %2606 = vmatmul.mubr.msk.f32.gmra.mrb[16].mxu0 %vm562_vm4, %v3993_v27 }
 0x325   : > { %3163 = vpow2.f32 %v599_v3  ;;  %v589_v33 = vsub.f32 %v3871_v40, %v580_v5  ;;  %2906 = vmatpush3.bf16.msra.mxu0 %v2905_v61  ;;  %2608 = vmatprep.mubr.msk.f32.mxu0 %vm3367_vm0, %v3368_v1  ;;  %v3138_v61 = vunpack.i.l.bf16 %v3967_v15 }
 0x326   : > { %2907 = vmatprep.subr.bf16.mxu0 %v3366_v0 }
 0x327   : > { %v4003_v9 = vpop.eup %3159  ;;  %v601_v43 = vmul.f32 1.442695, %v589_v33  ;;  %v2929_v33 = vpack.c.bf16 %v3139_v6, %v3138_v61 }
 0x328   : > { %v583_v23 = vpop.xlane.xlu1 %582  ;;  %2609 = vmatmul.mubr.msk.f32.gmra.mrb[18].mxu0 %vm562_vm4, %v4003_v9 }
 0x329   : > { %3165 = vpow2.f32 %v601_v43  ;;  %v590_v62 = vsub.f32 %v3875_v46, %v583_v23  ;;  %2909 = vmatpush3.bf16.msra.mxu0 %v2908_v10  ;;  %2611 = vmatprep.mubr.msk.f32.mxu0 %vm3367_vm0, %v3368_v1 }
 0x32a   : > { %2670 = vmatprep.subr.mxu0 %v3368_v1 }
 0x32b   : > { %v4011_v40 = vpop.eup %3161  ;;  %v603_v24 = vmul.f32 1.442695, %v590_v62 }
 0x32c   : > { %2612 = vmatmul.mubr.msk.f32.gmra.mrb[20].mxu0 %vm562_vm4, %v4011_v40  ;;  %v955_v26 = vpop.xlane.xlu1 %954 }
 0x32d   : > { %3167 = vpow2.f32 %v603_v24  ;;  %2671 = vmatpush3.msra.mxu0 %v1036_v16  ;;  %v974_v28 = vsub.f32 %v3879_v51, %v955_v26  ;;  %2614 = vmatprep.mubr.msk.f32.mxu0 %vm3367_vm0, %v3368_v1 }
 0x32e   : > { %2922 = vmatprep.subr.bf16.mxu0 %v3366_v0 }
 0x32f   : > { %v4019_v46 = vpop.eup %3163  ;;  %v981_v30 = vmul.f32 1.442695, %v974_v28 }
 0x330   : > { %2615 = vmatmul.mubr.msk.f32.gmra.mrb[22].mxu0 %vm562_vm4, %v4019_v46  ;;  %v958_v38 = vpop.xlane.xlu1 %957 }
 0x331   : > { %3169 = vpow2.f32 %v981_v30  ;;  %v975_v36 = vsub.f32 %v3883_v58, %v958_v38  ;;  %2617 = vmatprep.mubr.msk.f32.mxu0 %vm3367_vm0, %v3368_v1  ;;  %v3129_v58 = vunpack.i.h.bf16 %v3965_v11 }
 0x333   : > { %v4026_v16 = vpop.eup %3165  ;;  %v983_v51 = vmul.f32 1.442695, %v975_v36  ;;  %v2923_v53 = vpack.c.bf16 %v3129_v58, %v3128_v41  ;;  %v3143_v58 = vunpack.i.l.bf16 %v3969_v18 }
 0x334   : > { %2618 = vmatmul.mubr.msk.f32.gmra.mrb[24].mxu0 %vm562_vm4, %v4026_v16  ;;  %v961_v34 = vpop.xlane.xlu1 %960 }
 0x335   : > { %3171 = vpow2.f32 %v983_v51  ;;  %v976_v35 = vsub.f32 %v3887_v2, %v961_v34  ;;  %2620 = vmatprep.mubr.msk.f32.mxu0 %vm3367_vm0, %v3368_v1 }
 0x337   : > { %v4033_v39 = vpop.eup %3167  ;;  %v985_v44 = vmul.f32 1.442695, %v976_v35  ;;  %v3144_v35 = vunpack.i.h.bf16 %v3969_v18 }
 0x338   : > { %2621 = vmatmul.mubr.msk.f32.gmra.mrb[26].mxu0 %vm562_vm4, %v4033_v39  ;;  %v964_v12 = vpop.xlane.xlu1 %963 }
 0x339   : > { %3173 = vpow2.f32 %v985_v44  ;;  %v977_v45 = vsub.f32 %v3891_v8, %v964_v12  ;;  %2672 = vmatprep.mubr.msk.f32.mxu0 %vm3367_vm0, %v3368_v1  ;;  %v3147_v44 = vpop.permute.xlu0 %3146  ;;  %v2944_v17 = vpack.c.bf16 %v3144_v35, %v3143_v58 }
 0x33a   : > { %v3149_v49 = vunpack.i.h.bf16 %v3147_v44 }
 0x33b   : > { %v3170_v2 = vpop.eup %3169  ;;  %v987_v22 = vmul.f32 1.442695, %v977_v45 }
 0x33c   : > { %2673 = vmatmul.mubr.msk.f32.vlgmr.msra.gmra.mrb[28].mxu0 %vm562_vm4, %v3170_v2  ;;  %v967_v11 = vpop.xlane.xlu1 %966  ;;  %v995_v54 = vsel %vm562_vm4, %v3170_v2, 0.0 }
 0x33d   : > { %3175 = vpow2.f32 %v987_v22  ;;  %2924 = vmatpush3.bf16.msra.mxu0 %v2923_v53  ;;  %v978_v59 = vsub.f32 %v3895_v13, %v967_v11  ;;  %996 = vadd.xlane.f32.xlu0 %v995_v54  ;;  %v3148_v53 = vunpack.i.l.bf16 %v3147_v44 }
 0x33e   : > { %2675 = vmatprep.mubr.msk.f32.mxu0 %vm3367_vm0, %v3368_v1  ;;  %2925 = vmatprep.subr.bf16.mxu0 %v3366_v0 }
 0x33f   : > { %v3172_v8 = vpop.eup %3171  ;;  %v989_v63 = vmul.f32 1.442695, %v978_v59 }
 0x340   : > { %2676 = vmatmul.mubr.msk.f32.gmra.mrb[30].mxu0 %vm562_vm4, %v3172_v8  ;;  %v970_v55 = vpop.xlane.xlu1 %969  ;;  %v998_v3 = vsel %vm562_vm4, %v3172_v8, 0.0  ;;  %v2947_v8 = vpack.c.bf16 %v3149_v49, %v3148_v53 }
 0x341   : > { %3177 = vpow2.f32 %v989_v63  ;;  %2927 = vmatpush3.bf16.msra.mxu0 %v2926_v52  ;;  %v979_v13 = vsub.f32 %v3901_v19, %v970_v55  ;;  %999 = vadd.xlane.f32.xlu1 %v998_v3 }
 0x342   : > { %2678 = vmatprep.mubr.msk.f32.mxu0 %vm3367_vm0, %v3368_v1  ;;  %2928 = vmatprep.subr.bf16.mxu0 %v3366_v0 }
 0x343   : > { %v3174_v5 = vpop.eup %3173  ;;  %v991_v10 = vmul.f32 1.442695, %v979_v13 }
 0x344   : > { %2679 = vmatmul.mubr.msk.f32.gmra.mrb[32].mxu0 %vm562_vm4, %v3174_v5  ;;  %v973_v15 = vpop.xlane.xlu1 %972  ;;  %v1001_v43 = vsel %vm562_vm4, %v3174_v5, 0.0 }
 0x345   : > { %3179 = vpow2.f32 %v991_v10  ;;  %2930 = vmatpush3.bf16.msra.mxu0 %v2929_v33  ;;  %v980_v23 = vsub.f32 %v3905_v25, %v973_v15  ;;  %1002 = vadd.xlane.f32.xlu0 %v1001_v43 }
 0x346   : > { %2681 = vmatprep.mubr.msk.f32.mxu0 %vm3367_vm0, %v3368_v1  ;;  %2740 = vmatprep.subr.mxu0 %v3368_v1 }
 0x347   : > { %v3176_v19 = vpop.eup %3175  ;;  %v993_v62 = vmul.f32 1.442695, %v980_v23 }
 0x348   : > { %2682 = vmatmul.mubr.msk.f32.gmra.mrb[34].mxu0 %vm562_vm4, %v3176_v19  ;;  %v1374_v24 = vpop.xlane.xlu1 %1373  ;;  %v1004_v26 = vsel %vm562_vm4, %v3176_v19, 0.0 }
 0x349   : > { %3181 = vpow2.f32 %v993_v62  ;;  %2741 = vmatpush3.msra.mxu0 %v3971_v20  ;;  %v1393_v28 = vsub.f32 %v3909_v31, %v1374_v24  ;;  %1005 = vadd.xlane.f32.xlu0 %v1004_v26 }
 0x34a   : > { %2684 = vmatprep.mubr.msk.f32.mxu0 %vm3367_vm0, %v3368_v1  ;;  %2943 = vmatprep.subr.bf16.mxu0 %v3366_v0 }
 0x34b   : > { %v3178_v25 = vpop.eup %3177  ;;  %v1400_v30 = vmul.f32 1.442695, %v1393_v28 }
 0x34c   : > { %2685 = vmatmul.mubr.msk.f32.gmra.mrb[36].mxu0 %vm562_vm4, %v3178_v25  ;;  %v1007_v38 = vsel %vm562_vm4, %v3178_v25, 0.0 }
 0x34d   : > { %3183 = vpow2.f32 %v1400_v30  ;;  %1008 = vadd.xlane.f32.xlu0 %v1007_v38  ;;  %2687 = vmatprep.mubr.msk.f32.mxu0 %vm3367_vm0, %v3368_v1 }
 0x34f   : > { %v3180_v20 = vpop.eup %3179 }
 0x350   : > { %2688 = vmatmul.mubr.msk.f32.gmra.mrb[38].mxu0 %vm562_vm4, %v3180_v20  ;;  %v1380_v31 = vpop.xlane.xlu1 %1379  ;;  %v1010_v36 = vsel %vm562_vm4, %v3180_v20, 0.0 }
 0x351   : > { %v1395_v51 = vsub.f32 %v3913_v42, %v1380_v31  ;;  %1011 = vadd.xlane.f32.xlu0 %v1010_v36  ;;  %2690 = vmatprep.mubr.msk.f32.mxu0 %vm3367_vm0, %v3368_v1 }
 0x353   : > { %v3182_v34 = vpop.eup %3181  ;;  %v1404_v41 = vmul.f32 1.442695, %v1395_v51 }
 0x354   : > { %2691 = vmatmul.mubr.msk.f32.gmra.mrb[40].mxu0 %vm562_vm4, %v3182_v34  ;;  %v1383_v12 = vpop.xlane.xlu1 %1382  ;;  %v1013_v45 = vsel %vm562_vm4, %v3182_v34, 0.0 }
 0x355   : > { %3185 = vpow2.f32 %v1404_v41  ;;  %v1396_v2 = vsub.f32 %v3917_v50, %v1383_v12  ;;  %1014 = vadd.xlane.f32.xlu0 %v1013_v45  ;;  %2742 = vmatprep.mubr.msk.f32.mxu0 %vm3367_vm0, %v3368_v1 }
 0x357   : > { %v3184_v42 = vpop.eup %3183  ;;  %v1406_v22 = vmul.f32 1.442695, %v1396_v2 }
 0x358   : > { %2743 = vmatmul.mubr.msk.f32.vlgmr.msra.gmra.mrb[42].mxu0 %vm562_vm4, %v3184_v42  ;;  %v1386_v18 = vpop.xlane.xlu1 %1385  ;;  %v1414_v11 = vsel %vm562_vm4, %v3184_v42, 0.0 }
 0x359   : > { %3187 = vpow2.f32 %v1406_v22  ;;  %2945 = vmatpush3.bf16.msra.mxu0 %v2944_v17  ;;  %v1397_v54 = vsub.f32 %v3923_v60, %v1386_v18  ;;  %v1377_v59 = vpop.xlane.xlu0 %1376  ;;  %1415 = vadd.xlane.f32.xlu1 %v1414_v11  ;;  %v611_v18 = vsel %vm562_vm4, %v4003_v9, 0.0 }
 0x35a   : > { %v1394_v50 = vsub.f32 %v3921_v57, %v1377_v59  ;;  %2946 = vmatprep.subr.bf16.mxu0 %v3366_v0  ;;  %2745 = vmatprep.mubr.msk.f32.mxu0 %vm3367_vm0, %v3368_v1 }
 0x35b   : > { %v1408_v52 = vmul.f32 1.442695, %v1397_v54  ;;  %v617_v54 = vsel %vm562_vm4, %v4019_v46, 0.0 }
 0x35c   : > { %v1402_v6 = vmul.f32 1.442695, %v1394_v50 }
 0x35d   : > { %3189 = vpow2.f32 %v1408_v52  ;;  %2948 = vmatpush3.bf16.msra.mxu0 %v2947_v8  ;;  %v1389_v61 = vpop.xlane.xlu0 %1388  ;;  %v620_v8 = vsel %vm562_vm4, %v4026_v16, 0.0 }
 0x35e   : > { %3191 = vpow2.f32 %v1402_v6  ;;  %v1398_v63 = vsub.f32 %v3929_v7, %v1389_v61  ;;  %2949 = vmatprep.subr.bf16.mxu0 %v3366_v0  ;;  %v623_v6 = vsel %vm562_vm4, %v4033_v39, 0.0 }
 0x35f   : > { %v3186_v60 = vpop.eup %3185 }
 0x360   : > { %v1410_v55 = vmul.f32 1.442695, %v1398_v63  ;;  %v1392_v3 = vpop.xlane.xlu1 %1391  ;;  %v1420_v57 = vsel %vm562_vm4, %v3186_v60, 0.0 }
 0x361   : > { %v1399_v13 = vsub.f32 %v3933_v14, %v1392_v3  ;;  %1421 = vadd.xlane.f32.xlu1 %v1420_v57  ;;  %v614_v3 = vsel %vm562_vm4, %v4011_v40, 0.0  ;;  %v605_v57 = vsel %vm562_vm4, %v3983_v48, 0.0 }
 0x362   : > { %3193 = vpow2.f32 %v1410_v55 }
 0x363   : > { %v3188_v5 = vpop.eup %3187  ;;  %v1412_v33 = vmul.f32 1.442695, %v1399_v13 }
 0x364   : > { %v1793_v10 = vpop.xlane.xlu0 %1792  ;;  %v1423_v15 = vsel %vm562_vm4, %v3188_v5, 0.0 }
 0x365   : > { %3195 = vpow2.f32 %v1412_v33  ;;  %v1812_v43 = vsub.f32 %v3937_v21, %v1793_v10  ;;  %1424 = vadd.xlane.f32.xlu0 %v1423_v15 }
 0x367   : > { %v3190_v7 = vpop.eup %3189  ;;  %v1819_v23 = vmul.f32 1.442695, %v1812_v43 }
 0x368   : > { %v3192_v19 = vpop.eup %3191  ;;  %v1796_v62 = vpop.xlane.xlu1 %1795  ;;  %v1426_v24 = vsel %vm562_vm4, %v3190_v7, 0.0 }
 0x369   : > { %3197 = vpow2.f32 %v1819_v23  ;;  %v1813_v14 = vsub.f32 %v3941_v29, %v1796_v62  ;;  %2746 = vmatmul.mubr.msk.f32.gmra.mrb[44].mxu0 %vm562_vm4, %v3192_v19  ;;  %1427 = vadd.xlane.f32.xlu0 %v1426_v24  ;;  %v1417_v26 = vsel %vm562_vm4, %v3192_v19, 0.0 }
 0x36a   : > { %1418 = vadd.xlane.f32.xlu1 %v1417_v26  ;;  %2748 = vmatprep.mubr.msk.f32.mxu0 %vm3367_vm0, %v3368_v1 }
 0x36b   : > { %v1821_v21 = vmul.f32 1.442695, %v1813_v14 }
 0x36c   : > { %v3194_v28 = vpop.eup %3193  ;;  %v1799_v25 = vpop.xlane.xlu1 %1798 }
 0x36d   : > { %3199 = vpow2.f32 %v1821_v21  ;;  %v1814_v30 = vsub.f32 %v3945_v37, %v1799_v25  ;;  %2749 = vmatmul.mubr.msk.f32.gmra.mrb[46].mxu0 %vm562_vm4, %v3186_v60  ;;  %v1429_v38 = vsel %vm562_vm4, %v3194_v28, 0.0 }
 0x36e   : > { %1430 = vadd.xlane.f32.xlu0 %v1429_v38  ;;  %2751 = vmatprep.mubr.msk.f32.mxu0 %vm3367_vm0, %v3368_v1 }
 0x36f   : > { %v3196_v29 = vpop.eup %3195  ;;  %v1823_v20 = vmul.f32 1.442695, %v1814_v30 }
 0x370   : > { %v1802_v31 = vpop.xlane.xlu1 %1801  ;;  %v1432_v36 = vsel %vm562_vm4, %v3196_v29, 0.0 }
 0x371   : > { %3201 = vpow2.f32 %v1823_v20  ;;  %v1815_v51 = vsub.f32 %v3949_v47, %v1802_v31  ;;  %2752 = vmatmul.mubr.msk.f32.gmra.mrb[48].mxu0 %vm562_vm4, %v3188_v5 }
 0x372   : > { %1433 = vadd.xlane.f32.xlu0 %v1432_v36  ;;  %2754 = vmatprep.mubr.msk.f32.mxu0 %vm3367_vm0, %v3368_v1 }
 0x373   : > { %v3198_v37 = vpop.eup %3197  ;;  %v1825_v34 = vmul.f32 1.442695, %v1815_v51 }
 0x374   : > { %v1805_v35 = vpop.xlane.xlu0 %1804  ;;  %v1833_v58 = vsel %vm562_vm4, %v3198_v37, 0.0 }
 0x375   : > { %3203 = vpow2.f32 %v1825_v34  ;;  %v1816_v41 = vsub.f32 %v3953_v56, %v1805_v35  ;;  %2755 = vmatmul.mubr.msk.f32.gmra.mrb[50].mxu0 %vm562_vm4, %v3190_v7  ;;  %1834 = vadd.xlane.f32.xlu1 %v1833_v58 }
 0x376   : > { %2757 = vmatprep.mubr.msk.f32.mxu0 %vm3367_vm0, %v3368_v1 }
 0x377   : > { %v3200_v47 = vpop.eup %3199  ;;  %v1827_v44 = vmul.f32 1.442695, %v1816_v41 }
 0x378   : > { %v3152_v12 = vpop.permute.xlu0 %3151  ;;  %v1808_v45 = vpop.xlane.xlu1 %1807  ;;  %v1836_v2 = vsel %vm562_vm4, %v3200_v47, 0.0 }
 0x379   : > { %3205 = vpow2.f32 %v1827_v44  ;;  %v3154_v42 = vunpack.i.h.bf16 %v3152_v12  ;;  %v3153_v17 = vunpack.i.l.bf16 %v3152_v12  ;;  %v1817_v49 = vsub.f32 %v3957_v4, %v1808_v45  ;;  %2758 = vmatmul.mubr.msk.f32.gmra.mrb[52].mxu0 %vm562_vm4, %v3194_v28  ;;  %1837 = vadd.xlane.f32.xlu1 %v1836_v2 }
 0x37a   : > { %2760 = vmatprep.mubr.msk.f32.mxu0 %vm3367_vm0, %v3368_v1 }
 0x37b   : > { %v3202_v56 = vpop.eup %3201  ;;  %v2950_v53 = vpack.c.bf16 %v3154_v42, %v3153_v17  ;;  %v1829_v22 = vmul.f32 1.442695, %v1817_v49 }
 0x37c   : > { %v1839_v11 = vsel %vm562_vm4, %v3202_v56, 0.0  ;;  %v1874_v9 = vpop.permute.xlu1 %1873 }
 0x37d   : > { %3207 = vpow2.f32 %v1829_v22  ;;  %2761 = vmatmul.mubr.msk.f32.gmra.mrb[54].mxu0 %vm562_vm4, %v3196_v29  ;;  %612 = vadd.xlane.f32.xlu1 %v611_v18 }
 0x37e   : > { %2951 = vmatpush3.bf16.msra.mxu0 %v2950_v53  ;;  %1840 = vadd.xlane.f32.xlu0 %v1839_v11 }
 0x37f   : > { %v3204_v4 = vpop.eup %3203  ;;  %2810 = vmatprep.subr.mxu0 %v3368_v1  ;;  %2812 = vmatprep.mubr.msk.f32.mxu0 %vm3367_vm0, %v3368_v1 }
 0x380   : > { %v1842_v59 = vsel %vm562_vm4, %v3204_v4, 0.0 }
 0x381   : > { %618 = vadd.xlane.f32.xlu1 %v617_v54 }
 0x382   : > { %2811 = vmatpush3.msra.mxu0 %v1874_v9  ;;  %1843 = vadd.xlane.f32.xlu0 %v1842_v59 }
 0x383   : > { %v3206_v50 = vpop.eup %3205  ;;  %2813 = vmatmul.mubr.msk.f32.vlgmr.msra.gmra.mrb[56].mxu0 %vm562_vm4, %v3198_v37  ;;  %2952 = vmatprep.subr.bf16.mxu0 %v3366_v0 }
 0x384   : > { %2815 = vmatprep.mubr.msk.f32.mxu0 %vm3367_vm0, %v3368_v1  ;;  %v1845_v52 = vsel %vm562_vm4, %v3206_v50, 0.0 }
 0x385   : > { %621 = vadd.xlane.f32.xlu1 %v620_v8 }
 0x386   : > { %1846 = vadd.xlane.f32.xlu0 %v1845_v52 }
 0x387   : > { %v3208_v46 = vpop.eup %3207  ;;  %2816 = vmatmul.mubr.msk.f32.gmra.mrb[58].mxu0 %vm562_vm4, %v3200_v47 }
 0x388   : > { %2818 = vmatprep.mubr.msk.f32.mxu0 %vm3367_vm0, %v3368_v1  ;;  %v1848_v61 = vsel %vm562_vm4, %v3208_v46, 0.0 }
 0x389   : > { %624 = vadd.xlane.f32.xlu1 %v623_v6 }
 0x38a   : > { %1849 = vadd.xlane.f32.xlu0 %v1848_v61 }
 0x38b   : > { %2819 = vmatmul.mubr.msk.f32.gmra.mrb[60].mxu0 %vm562_vm4, %v3202_v56 }
 0x38c   : > { %2821 = vmatprep.mubr.msk.f32.mxu0 %vm3367_vm0, %v3368_v1 }
 0x38f   : > { %2822 = vmatmul.mubr.msk.f32.gmra.mrb[62].mxu0 %vm562_vm4, %v3204_v4 }
 0x390   : > { %2824 = vmatprep.mubr.msk.f32.mxu0 %vm3367_vm0, %v3368_v1 }
 0x393   : > { %2825 = vmatmul.mubr.msk.f32.gmra.mrb[64].mxu0 %vm562_vm4, %v3206_v50 }
 0x394   : > { %2827 = vmatprep.mubr.msk.f32.mxu0 %vm3367_vm0, %v3368_v1 }
 0x397   : > { %2828 = vmatmul.mubr.msk.f32.gmra.mrb[66].mxu0 %vm562_vm4, %v3208_v46 }
 0x398   : > { %2830 = vmatprep.mubr.msk.f32.mxu0 %vm3367_vm0, %v3368_v1 }
 0x3a9   : > { %v1811_v16 = vpop.xlane.xlu0 %1810 }
 0x3aa   : > { %v1818_v39 = vsub.f32 %v3975_v32, %v1811_v16  ;;  %v608_v32 = vsel %vm562_vm4, %v3993_v27, 0.0 }
 0x3ac   : > { %v1831_v63 = vmul.f32 1.442695, %v1818_v39 }
 0x3ae   : > { %3209 = vpow2.f32 %v1831_v63 }
 0x3b8   : > { %v3210_v60 = vpop.eup %3209 }
 0x3b9   : > { %2831 = vmatmul.mubr.msk.f32.gmra.mrb[68].mxu0 %vm562_vm4, %v3210_v60  ;;  %v1851_v55 = vsel %vm562_vm4, %v3210_v60, 0.0 }
 0x3ba   : > { %1852 = vadd.xlane.f32.xlu0 %v1851_v55  ;;  %2841 = vmatprep.mubr.msk.f32.mxu0 %vm3367_vm0, %v3368_v1 }
 0x3be   : > { %615 = vadd.xlane.f32.xlu0 %v614_v3 }
 0x3c2   : > { %606 = vadd.xlane.f32.xlu0 %v605_v57 }
 0x3c6   : > { %609 = vadd.xlane.f32.xlu0 %v608_v32 }
 0x3ca   : > { %v997_v40 = vpop.xlane.xlu0 %996 }
 0x3cb   : > { %3211 = vrcp.f32 %v997_v40 }
 0x3ce   : > { %v1000_v13 = vpop.xlane.xlu1 %999 }
 0x3cf   : > { %3213 = vrcp.f32 %v1000_v13 }
 0x3d2   : > { %v1003_v62 = vpop.xlane.xlu0 %1002 }
 0x3d5   : > { %v3212_v37 = vpop.eup %3211 }
 0x3d6   : > { %v1006_v28 = vpop.xlane.xlu0 %1005 }
 0x3d9   : > { %v3214_v44 = vpop.eup %3213 }
 0x3da   : > { %v1009_v20 = vpop.xlane.xlu0 %1008 }
 0x3de   : > { %v1012_v41 = vpop.xlane.xlu0 %1011 }
 0x3e2   : > { %v4191_v53 = vpop.xlane.xlu0 %1014 }
 0x3e6   : > { %v4174_v10 = vpop.xlane.xlu1 %1415 }
 0x3ee   : > { %v4178_v7 = vpop.xlane.xlu1 %1421 }
 0x3f2   : > { %v1425_v9 = vpop.xlane.xlu0 %1424 }
 0x3f3   : > { %v4172_v5 = vpop.f32.mrb[14].mxu0 }
 0x3f4   : > { %v2604_v33 = vpop.f32.mrb[15].mxu0 }
 0x3f6   : > { %v1428_v55 = vpop.xlane.xlu0 %1427 }
 0x3f7   : > { %v4176_v15 = vpop.f32.mrb[16].mxu0  ;;  %v4180_v48 = vpop.xlane.xlu1 %1418 }
 0x3f8   : > { %v2607_v43 = vpop.f32.mrb[17].mxu0 }
 0x3fb   : > { %v751_v23 = vpop.f32.mrb[18].mxu0  ;;  %v1431_v43 = vpop.xlane.xlu0 %1430 }
 0x3fc   : > { %v2610_v19 = vpop.f32.mrb[19].mxu0 }
 0x3ff   : > { %v4182_v24 = vpop.f32.mrb[20].mxu0 }
 0x400   : > { %v2613_v27 = vpop.f32.mrb[21].mxu0 }
 0x402   : > { %v4184_v14 = vpop.xlane.xlu1 %1834 }
 0x403   : > { %v761_v26 = vpop.f32.mrb[22].mxu0 }
 0x404   : > { %v2616_v21 = vpop.f32.mrb[23].mxu0 }
 0x406   : > { %v4186_v25 = vpop.xlane.xlu1 %1837 }
 0x407   : > { %v766_v30 = vpop.f32.mrb[24].mxu0 }
 0x408   : > { %v2619_v38 = vpop.f32.mrb[25].mxu0 }
 0x40a   : > { %v613_v29 = vpop.xlane.xlu1 %612 }
 0x40b   : > { %3215 = vrcp.f32 %v613_v29  ;;  %v771_v31 = vpop.f32.mrb[26].mxu0 }
 0x40c   : > { %v2622_v36 = vpop.f32.mrb[27].mxu0  ;;  %3217 = vrcp.f32 %v1003_v62 }
 0x40e   : > { %v619_v51 = vpop.xlane.xlu1 %618 }
 0x40f   : > { %3219 = vrcp.f32 %v619_v51  ;;  %v1131_v34 = vpop.f32.mrb[28].mxu0 }
 0x410   : > { %v1165_v35 = vmul.f32 %v3212_v37, %v1131_v34  ;;  %v2674_v58 = vpop.f32.mrb[29].mxu0  ;;  %3221 = vrcp.f32 %v1006_v28 }
 0x412   : > { %v622_v47 = vpop.xlane.xlu1 %621  ;;  %1179 = vrot.lane.b32.xlu0 %v1165_v35, %s3380_s26 }
 0x413   : > { %3223 = vrcp.f32 %v622_v47  ;;  %v1136_v12 = vpop.f32.mrb[30].mxu0 }
 0x414   : > { %v4189_v45 = vmul.f32 %v3214_v44, %v1136_v12  ;;  %v2677_v2 = vpop.f32.mrb[31].mxu0  ;;  %3225 = vrcp.f32 %v1009_v20 }
 0x415   : > { %v3216_v42 = vpop.eup %3215 }
 0x416   : > { %v777_v17 = vmul.f32 %v3216_v42, %v751_v23  ;;  %v625_v49 = vpop.xlane.xlu1 %624  ;;  %v3218_v56 = vpop.eup %3217 }
 0x417   : > { %3227 = vrcp.f32 %v625_v49  ;;  %v1141_v22 = vpop.f32.mrb[32].mxu0  ;;  %v2054_v49 = vld [vmem:[%s4372_s4 + $0x8] sm:$0xff] }
 0x418   : > { %784 = vst.msk [vmem:[#allocation2 + $0x10] sm:$0xff] %vm433_vm2, %v777_v17  ;;  %v1167_v18 = vmul.f32 %v3218_v56, %v1141_v22  ;;  %v2680_v11 = vpop.f32.mrb[33].mxu0  ;;  %3229 = vrcp.f32 %v1012_v41  ;;  %v2053_v17 = vld [vmem:[%s4372_s4] sm:$0xff] }
 0x419   : > { %v3220_v4 = vpop.eup %3219  ;;  %3231 = vrcp.f32 %v4174_v10  ;;  %v2953_v22 = vpack.c.bf16 %v2054_v49, %v2053_v17 }
 0x41a   : > { %v779_v54 = vmul.f32 %v3220_v4, %v761_v26  ;;  %1183 = vrot.lane.b32.xlu0 %v1167_v18, %s3380_s26  ;;  %v3222_v59 = vpop.eup %3221  ;;  %v4204_v26 = vpop.xlane.xlu0 %1433  ;;  %3233 = vrcp.f32 %v4180_v48  ;;  %v2055_v4 = vld [vmem:[%s4372_s4 + $0x10] sm:$0xff] }
 0x41b   : > { %v1146_v50 = vpop.f32.mrb[34].mxu0  ;;  %3235 = vrcp.f32 %v4178_v7  ;;  %2954 = vmatpush3.bf16.msra.mxu0 %v2953_v22  ;;  %2960 = vmatpush3.bf16.msra.mxu1 %v2953_v22 }
 0x41c   : > { %786 = vst.msk [vmem:[#allocation2 + $0x20] sm:$0xff] %vm433_vm2, %v779_v54  ;;  %v1168_v8 = vmul.f32 %v3222_v59, %v1146_v50  ;;  %v2683_v52 = vpop.f32.mrb[35].mxu0  ;;  %3237 = vrcp.f32 %v1425_v9  ;;  %v2056_v54 = vld [vmem:[%s4372_s4 + $0x18] sm:$0xff]  ;;  %2955 = vmatprep.subr.bf16.mxu0 %v3366_v0  ;;  %2959 = vmatprep.subr.bf16.mxu1 %v3366_v0 }
 0x41d   : > { %v3224_v46 = vpop.eup %3223  ;;  %3239 = vrcp.f32 %v1428_v55  ;;  %v2956_v50 = vpack.c.bf16 %v2056_v54, %v2055_v4 }
 0x41e   : > { %v780_v6 = vmul.f32 %v3224_v46, %v766_v30  ;;  %1185 = vrot.lane.b32.xlu0 %v1168_v8, %s3380_s26  ;;  %v3226_v61 = vpop.eup %3225  ;;  %v1841_v21 = vpop.xlane.xlu0 %1840  ;;  %3241 = vrcp.f32 %v1431_v43 }
 0x41f   : > { %v1151_v16 = vpop.f32.mrb[36].mxu0  ;;  %3243 = vrcp.f32 %v4184_v14  ;;  %2957 = vmatpush3.bf16.msra.mxu0 %v2956_v50  ;;  %2961 = vmatpush3.bf16.msra.mxu1 %v2956_v50 }
 0x420   : > { %787 = vst.msk [vmem:[#allocation2 + $0x28] sm:$0xff] %vm433_vm2, %v780_v6  ;;  %v1169_v39 = vmul.f32 %v3226_v61, %v1151_v16  ;;  %v2686_v63 = vpop.f32.mrb[37].mxu0 }
 0x421   : > { %v3228_v60 = vpop.eup %3227 }
 0x422   : > { %v781_v3 = vmul.f32 %v3228_v60, %v771_v31  ;;  %1187 = vrot.lane.b32.xlu1 %v1169_v39, %s3380_s26  ;;  %v3230_v57 = vpop.eup %3229  ;;  %v1844_v28 = vpop.xlane.xlu0 %1843 }
 0x423   : > { %v1156_v32 = vpop.f32.mrb[38].mxu0  ;;  %v3232_v19 = vpop.eup %3231 }
 0x424   : > { %788 = vst.msk [vmem:[#allocation2 + $0x30] sm:$0xff] %vm433_vm2, %v781_v3  ;;  %v1170_v13 = vmul.f32 %v3230_v57, %v1156_v32  ;;  %v2689_v33 = vpop.f32.mrb[39].mxu0  ;;  %v3234_v30 = vpop.eup %3233 }
 0x425   : > { %v3236_v36 = vpop.eup %3235 }
 0x426   : > { %1189 = vrot.lane.b32.xlu1 %v1170_v13, %s3380_s26  ;;  %v4209_v29 = vpop.xlane.xlu0 %1846  ;;  %v3238_v7 = vpop.eup %3237 }
 0x427   : > { %v4202_v40 = vpop.f32.mrb[40].mxu0  ;;  %v3240_v44 = vpop.eup %3239 }
 0x428   : > { %v2692_v23 = vpop.f32.mrb[41].mxu0  ;;  %v3242_v18 = vpop.eup %3241 }
 0x429   : > { %v3244_v6 = vpop.eup %3243 }
 0x42a   : > { %v4213_v35 = vpop.xlane.xlu0 %1849 }
 0x42b   : > { %v1550_v62 = vpop.f32.mrb[42].mxu0 }
 0x42c   : > { %v1584_v27 = vmul.f32 %v3232_v19, %v1550_v62  ;;  %v2744_v10 = vpop.f32.mrb[43].mxu0 }
 0x42e   : > { %1598 = vrot.lane.b32.xlu0 %v1584_v27, %s3381_s28 }
 0x43c   : > { %v1555_v38 = vpop.f32.mrb[44].mxu0 }
 0x43d   : > { %v4211_v20 = vmul.f32 %v3234_v30, %v1555_v38  ;;  %v2747_v31 = vpop.f32.mrb[45].mxu0 }
 0x440   : > { %v1560_v51 = vpop.f32.mrb[46].mxu0 }
 0x441   : > { %v1586_v37 = vmul.f32 %v3236_v36, %v1560_v51  ;;  %v2750_v34 = vpop.f32.mrb[47].mxu0 }
 0x443   : > { %1602 = vrot.lane.b32.xlu1 %v1586_v37, %s3381_s28 }
 0x444   : > { %v1565_v48 = vpop.f32.mrb[48].mxu0 }
 0x445   : > { %v1587_v58 = vmul.f32 %v3238_v7, %v1565_v48  ;;  %v2753_v41 = vpop.f32.mrb[49].mxu0 }
 0x447   : > { %v4216_v47 = vpop.xlane.xlu0 %1852  ;;  %1604 = vrot.lane.b32.xlu1 %v1587_v58, %s3381_s28 }
 0x448   : > { %v1570_v12 = vpop.f32.mrb[50].mxu0 }
 0x449   : > { %v1588_v2 = vmul.f32 %v3240_v44, %v1570_v12  ;;  %v2756_v42 = vpop.f32.mrb[51].mxu0 }
 0x44b   : > { %v616_v56 = vpop.xlane.xlu0 %615  ;;  %1606 = vrot.lane.b32.xlu0 %v1588_v2, %s3381_s28 }
 0x44c   : > { %3245 = vrcp.f32 %v616_v56  ;;  %v1575_v11 = vpop.f32.mrb[52].mxu0 }
 0x44d   : > { %v1589_v59 = vmul.f32 %v3242_v18, %v1575_v11  ;;  %v2759_v9 = vpop.f32.mrb[53].mxu0  ;;  %3247 = vrcp.f32 %v4186_v25 }
 0x44f   : > { %v607_v14 = vpop.xlane.xlu0 %606  ;;  %1608 = vrot.lane.b32.xlu1 %v1589_v59, %s3381_s28 }
 0x450   : > { %3249 = vrcp.f32 %v607_v14  ;;  %v1580_v8 = vpop.f32.mrb[54].mxu0 }
 0x451   : > { %v2762_v52 = vpop.f32.mrb[55].mxu0  ;;  %3251 = vrcp.f32 %v1841_v21 }
 0x453   : > { %v610_v46 = vpop.xlane.xlu0 %609 }
 0x454   : > { %3253 = vrcp.f32 %v610_v46 }
 0x455   : > { %3255 = vrcp.f32 %v4191_v53 }
 0x456   : > { %v3246_v61 = vpop.eup %3245  ;;  %v1969_v16 = vpop.f32.mrb[56].mxu0  ;;  %3257 = vrcp.f32 %v1844_v28 }
 0x457   : > { %v778_v0 = vmul.f32 %v3246_v61, %v4182_v24  ;;  %v2003_v39 = vmul.f32 %v3244_v6, %v1969_v16  ;;  %v2814_v25 = vpop.f32.mrb[57].mxu0  ;;  %v3248_v63 = vpop.eup %3247  ;;  %3259 = vrcp.f32 %v4204_v26 }
 0x458   : > { %3261 = vrcp.f32 %v4209_v29 }
 0x459   : > { %785 = vst.msk [vmem:[#allocation2 + $0x18] sm:$0xff] %vm433_vm2, %v778_v0  ;;  %2017 = vrot.lane.b32.xlu0 %v2003_v39, %s3382_s16  ;;  %3263 = vrcp.f32 %v4213_v35  ;;  %v2379_v0 = vld [vmem:[%s4373_s5] ss:$0 sm:$0xff] }
 0x45a   : > { %v3250_v60 = vpop.eup %3249  ;;  %v1974_v55 = vpop.f32.mrb[58].mxu0  ;;  %3265 = vrcp.f32 %v4216_v47 }
 0x45b   : > { %v775_v3 = vmul.f32 %v3250_v60, %v4172_v5  ;;  %v2004_v57 = vmul.f32 %v3248_v63, %v1974_v55  ;;  %v2817_v32 = vpop.f32.mrb[59].mxu0  ;;  %v3252_v53 = vpop.eup %3251 }
 0x45d   : > { %782 = vst.msk [vmem:[#allocation2] sm:$0xff] %vm433_vm2, %v775_v3 }
 0x45e   : > { %v3254_v24 = vpop.eup %3253  ;;  %v1979_v13 = vpop.f32.mrb[60].mxu0 }
 0x45f   : > { %v776_v33 = vmul.f32 %v3254_v24, %v4176_v15  ;;  %v2005_v43 = vmul.f32 %v3252_v53, %v1979_v13  ;;  %v2820_v23 = vpop.f32.mrb[61].mxu0  ;;  %v3256_v19 = vpop.eup %3255 }
 0x460   : > { %v3258_v5 = vpop.eup %3257  ;;  %v1171_v27 = vmul.f32 %v3256_v19, %v4202_v40 }
 0x461   : > { %783 = vst.msk [vmem:[#allocation2 + $0x8] sm:$0xff] %vm433_vm2, %v776_v33  ;;  %2021 = vrot.lane.b32.xlu1 %v2005_v43, %s3382_s16  ;;  %v3260_v15 = vpop.eup %3259 }
 0x462   : > { %v1984_v62 = vpop.f32.mrb[62].mxu0  ;;  %v1590_v28 = vmul.f32 %v3260_v15, %v1580_v8  ;;  %v3262_v38 = vpop.eup %3261 }
 0x463   : > { %v2006_v10 = vmul.f32 %v3258_v5, %v1984_v62  ;;  %v2823_v26 = vpop.f32.mrb[63].mxu0  ;;  %v3264_v36 = vpop.eup %3263 }
 0x465   : > { %1191 = vrot.lane.b32.xlu1 %v1171_v27, %s3380_s26  ;;  %2023 = vrot.lane.b32.xlu0 %v2006_v10, %s3382_s16 }
 0x466   : > { %v1989_v21 = vpop.f32.mrb[64].mxu0 }
 0x467   : > { %v2826_v30 = vpop.f32.mrb[65].mxu0  ;;  %v2007_v40 = vmul.f32 %v3262_v38, %v1989_v21 }
 0x469   : > { %1610 = vrot.lane.b32.xlu1 %v1590_v28, %s3381_s28  ;;  %1181 = vrot.lane.b32.xlu0 %v4189_v45, %s3380_s26  ;;  %v3266_v45 = vpop.eup %3265 }
 0x46a   : > { %v1994_v29 = vpop.f32.mrb[66].mxu0 }
 0x46b   : > { %v2829_v31 = vpop.f32.mrb[67].mxu0  ;;  %v2008_v51 = vmul.f32 %v3264_v36, %v1994_v29 }
 0x46d   : > { %1600 = vrot.lane.b32.xlu0 %v4211_v20, %s3381_s28  ;;  %2025 = vrot.lane.b32.xlu1 %v2007_v40, %s3382_s16  ;;  %s4306_s28 = scalar_lea.vmem [#allocation6], %s2962_s18 }
 0x46e   : > { %s2206_s29 = sshll.u32 %s4306_s28, 4  ;;  %s4316_s29 = int_to_ptr.vmem [resolvable:$true] %s2206_s29 }
 0x46f   : > { %s3295_s14 = scalar_lea.vmem %s4316_s29, 896  ;;  %p3302_p2 = scmp.lt.s32.totalorder %s4316_s29, %s3300_s15 }
 0x470   : > { %p3296_p6 = scmp.ne.s32.totalorder %s4316_s29, %s3295_s14 }
 0x471   : > { %2019 = vrot.lane.b32.xlu0 %v2004_v57, %s3382_s16  ;;  %2027 = vrot.lane.b32.xlu1 %v2008_v51, %s3382_s16 }
 0x472   : > { %p3297_p10 = pnand %p3296_p6, %p4387_p9 }
 0x474   : > { %p3298_p12 = pneg %p3297_p10 }
 0x484   : > { %v1180_v37 = vpop.permute.xlu0 %1179 }
 0x485   : > { %1201 = vst.msk [vmem:[#allocation2] sm:$0xff] %vm1200_vm5, %v1180_v37 }
 0x48c   : > { %v1184_v34 = vpop.permute.xlu0 %1183  ;;  %v1999_v35 = vpop.f32.mrb[68].mxu0 }
 0x48d   : > { %1203 = vst.msk [vmem:[#allocation2 + $0x10] sm:$0xff] %vm1200_vm5, %v1184_v34  ;;  %v2009_v20 = vmul.f32 %v3266_v45, %v1999_v35  ;;  %v2832_v7 = vpop.f32.mrb[69].mxu0 }
 0x48f   : > { %2029 = vrot.lane.b32.xlu1 %v2009_v20, %s3382_s16  ;;  %s3301_s16 = scalar_lea.vmem %s3300_s15, 1792 }
 0x490   : > { %v1186_v48 = vpop.permute.xlu0 %1185  ;;  %p3303_p3 = scmp.lt.s32.totalorder %s3301_s16, %s3295_s14 }
 0x491   : > { %1204 = vst.msk [vmem:[#allocation2 + $0x18] sm:$0xff] %vm1200_vm5, %v1186_v48 }
 0x492   : > { %p3304_p4 = por %p3303_p3, %p3302_p2 }
 0x494   : > { %v1188_v58 = vpop.permute.xlu1 %1187  ;;  %p3305_p7 = pnand %p3304_p4, %p3298_p12 }
 0x495   : > { %1205 = vst.msk [vmem:[#allocation2 + $0x20] sm:$0xff] %vm1200_vm5, %v1188_v58 }
 0x498   : > { %v1190_v41 = vpop.permute.xlu1 %1189 }
 0x499   : > { %1206 = vst.msk [vmem:[#allocation2 + $0x28] sm:$0xff] %vm1200_vm5, %v1190_v41 }
 0x4a0   : > { %v1599_v47 = vpop.permute.xlu0 %1598 }
 0x4a1   : > { %1620 = vst.msk [vmem:[#allocation2] sm:$0xff] %vm1619_vm6, %v1599_v47 }
 0x4b5   : > { %v1603_v44 = vpop.permute.xlu1 %1602 }
 0x4b6   : > { %1622 = vst.msk [vmem:[#allocation2 + $0x10] sm:$0xff] %vm1619_vm6, %v1603_v44 }
 0x4b9   : > { %v1605_v12 = vpop.permute.xlu1 %1604 }
 0x4ba   : > { %1623 = vst.msk [vmem:[#allocation2 + $0x18] sm:$0xff] %vm1619_vm6, %v1605_v12 }
 0x4bd   : > { %v1607_v2 = vpop.permute.xlu0 %1606 }
 0x4be   : > { %1624 = vst.msk [vmem:[#allocation2 + $0x20] sm:$0xff] %vm1619_vm6, %v1607_v2 }
 0x4c1   : > { %v1609_v42 = vpop.permute.xlu1 %1608 }
 0x4c2   : > { %1625 = vst.msk [vmem:[#allocation2 + $0x28] sm:$0xff] %vm1619_vm6, %v1609_v42 }
 0x4cb   : > { %v2018_v17 = vpop.permute.xlu0 %2017 }
 0x4cc   : > { %2039 = vst.msk [vmem:[#allocation2] sm:$0xff] %vm2038_vm7, %v2018_v17 }
 0x4d3   : > { %v2022_v49 = vpop.permute.xlu1 %2021  ;;  %v2046_v56 = vld [vmem:[#allocation2] sm:$0xff] }
 0x4d4   : > { %2041 = vst.msk [vmem:[#allocation2 + $0x10] sm:$0xff] %vm2038_vm7, %v2022_v49  ;;  %2842 = vmatmul.mubr.msk.f32.vlgmr.msra.gmra.mrb[70].mxu0 %vm283_vm1, %v2046_v56 }
 0x4d5   : > { %2844 = vmatprep.mubr.msk.f32.mxu0 %vm3367_vm0, %v3368_v1 }
 0x4d7   : > { %v1192_v22 = vpop.permute.xlu1 %1191  ;;  %v2024_v18 = vpop.permute.xlu0 %2023 }
 0x4d8   : > { %1207 = vst.msk [vmem:[#allocation2 + $0x30] sm:$0xff] %vm1200_vm5, %v1192_v22 }
 0x4d9   : > { %2042 = vst.msk [vmem:[#allocation2 + $0x18] sm:$0xff] %vm2038_vm7, %v2024_v18 }
 0x4db   : > { %v1611_v11 = vpop.permute.xlu1 %1610  ;;  %v1182_v4 = vpop.permute.xlu0 %1181  ;;  %v2048_v54 = vld [vmem:[#allocation2 + $0x10] sm:$0xff] }
 0x4dc   : > { %1626 = vst.msk [vmem:[#allocation2 + $0x30] sm:$0xff] %vm1619_vm6, %v1611_v11  ;;  %2848 = vmatmul.mubr.msk.f32.vlgmr.msra.gmra.mrb[56].mxu1 %vm283_vm1, %v2048_v54 }
 0x4dd   : > { %1202 = vst.msk [vmem:[#allocation2 + $0x8] sm:$0xff] %vm1200_vm5, %v1182_v4  ;;  %2850 = vmatprep.mubr.msk.f32.mxu1 %vm3367_vm0, %v3368_v1 }
 0x4df   : > { %v1601_v59 = vpop.permute.xlu0 %1600  ;;  %v2026_v9 = vpop.permute.xlu1 %2025 }
 0x4e0   : > { %v2049_v50 = vld [vmem:[#allocation2 + $0x18] sm:$0xff]  ;;  %1621 = vst.msk [vmem:[#allocation2 + $0x8] sm:$0xff] %vm1619_vm6, %v1601_v59 }
 0x4e1   : > { %2043 = vst.msk [vmem:[#allocation2 + $0x20] sm:$0xff] %vm2038_vm7, %v2026_v9  ;;  %2851 = vmatmul.mubr.msk.f32.gmra.mrb[58].mxu1 %vm283_vm1, %v2049_v50 }
 0x4e2   : > { %2853 = vmatprep.mubr.msk.f32.mxu1 %vm3367_vm0, %v3368_v1 }
 0x4e3   : > { %v2020_v14 = vpop.permute.xlu0 %2019  ;;  %v2028_v8 = vpop.permute.xlu1 %2027 }
 0x4e4   : > { %2040 = vst.msk [vmem:[#allocation2 + $0x8] sm:$0xff] %vm2038_vm7, %v2020_v14  ;;  %2044 = vst.msk [vmem:[#allocation2 + $0x28] sm:$0xff] %vm2038_vm7, %v2028_v8 }
 0x4e8   : > { %v2050_v52 = vld [vmem:[#allocation2 + $0x20] sm:$0xff] }
 0x4e9   : > { %2854 = vmatmul.mubr.msk.f32.gmra.mrb[60].mxu1 %vm283_vm1, %v2050_v52 }
 0x4ea   : > { %2856 = vmatprep.mubr.msk.f32.mxu1 %vm3367_vm0, %v3368_v1 }
 0x4eb   : > { %v2047_v46 = vld [vmem:[#allocation2 + $0x8] sm:$0xff] }
 0x4ec   : > { %v2051_v6 = vld [vmem:[#allocation2 + $0x28] sm:$0xff]  ;;  %2845 = vmatmul.mubr.msk.f32.gmra.mrb[72].mxu0 %vm283_vm1, %v2047_v46 }
 0x4ed   : > { %2857 = vmatmul.mubr.msk.f32.gmra.mrb[62].mxu1 %vm283_vm1, %v2051_v6 }
 0x4ee   : > { %2859 = vmatprep.mubr.msk.f32.mxu1 %vm3367_vm0, %v3368_v1 }
 0x501   : > { %v2030_v61 = vpop.permute.xlu1 %2029 }
 0x502   : > { %2045 = vst.msk [vmem:[#allocation2 + $0x30] sm:$0xff] %vm2038_vm7, %v2030_v61 }
 0x509   : > { %v2052_v16 = vld [vmem:[#allocation2 + $0x30] sm:$0xff] }
 0x50a   : > { %2860 = vmatmul.mubr.msk.f32.gmra.mrb[64].mxu1 %vm283_vm1, %v2052_v16 }
 0x5a7   : > { %v2151_v39 = vpop.f32.mrb[70].mxu0 }
 0x5a8   : > { %v2152_v25 = vadd.f32 %v2379_v0, %v2151_v39  ;;  %v2843_v63 = vpop.f32.mrb[71].mxu0 }
 0x5aa   : > { %2185 = vst [vmem:[%s4306_s28] sm:$0xff] %v2152_v25 }
 0x5af   : > { %v2161_v1 = vpop.f32.mrb[56].mxu1 }
 0x5b0   : > { %v2162_v60 = vadd.f32 %v2379_v0, %v2161_v1  ;;  %v2849_v55 = vpop.f32.mrb[57].mxu1 }
 0x5b2   : > { %2187 = vst [vmem:[%s4306_s28 + $0x10] sm:$0xff] %v2162_v60 }
 0x5b4   : > { %v2166_v3 = vpop.f32.mrb[58].mxu1 }
 0x5b5   : > { %v2167_v57 = vadd.f32 %v2379_v0, %v2166_v3  ;;  %v2852_v32 = vpop.f32.mrb[59].mxu1 }
 0x5b7   : > { %2188 = vst [vmem:[%s4306_s28 + $0x18] sm:$0xff] %v2167_v57 }
 0x5bc   : > { %v2171_v53 = vpop.f32.mrb[60].mxu1 }
 0x5bd   : > { %v2172_v24 = vadd.f32 %v2379_v0, %v2171_v53  ;;  %v2855_v13 = vpop.f32.mrb[61].mxu1 }
 0x5bf   : > { %2189 = vst [vmem:[%s4306_s28 + $0x20] sm:$0xff] %v2172_v24  ;;  %v2156_v33 = vpop.f32.mrb[72].mxu0 }
 0x5c0   : > { %v2176_v43 = vpop.f32.mrb[62].mxu1  ;;  %v2157_v23 = vadd.f32 %v2379_v0, %v2156_v33  ;;  %v2846_v5 = vpop.f32.mrb[73].mxu0 }
 0x5c1   : > { %v2177_v19 = vadd.f32 %v2379_v0, %v2176_v43  ;;  %v2858_v62 = vpop.f32.mrb[63].mxu1 }
 0x5c2   : > { %2186 = vst [vmem:[%s4306_s28 + $0x8] sm:$0xff] %v2157_v23 }
 0x5c3   : > { %2190 = vst [vmem:[%s4306_s28 + $0x28] sm:$0xff] %v2177_v19 }
 0x5dd   : > { %v2181_v27 = vpop.f32.mrb[64].mxu1 }
 0x5de   : > { %v2182_v10 = vadd.f32 %v2379_v0, %v2181_v27  ;;  %v2861_v26 = vpop.f32.mrb[65].mxu1 }
 0x5e0   : > { %2191 = vst [vmem:[%s4306_s28 + $0x30] sm:$0xff] %v2182_v10 }
 0x5e1   : > { %3308 = shalt.err (!%p3305_p7)
}
 0x5e2   : > { %s3309_s17 = scalar_lea.hbm %s4321_s12, 896  ;;  %s3313_s20 = scalar_lea.hbm %s4374_s6, 1792 }
 0x5e3   : > { %p3310_p8 = scmp.ne.s32.totalorder %s4321_s12, %s3309_s17  ;;  %p3314_p1 = scmp.lt.u32.totalorder %s4321_s12, %s4374_s6 }
 0x5e4   : > { %p3315_p0 = scmp.lt.u32.totalorder %s3313_s20, %s3309_s17  ;;  %p3317_p6 = scmp.lt.u32.totalorder %s3309_s17, %s4321_s12 }
 0x5e5   : > { %p3311_p11 = pnand %p3310_p8, %p4387_p9 }
 0x5e6   : > { %p3316_p5 = por %p3315_p0, %p3314_p1 }
 0x5e7   : > { %p3312_p13 = pneg %p3311_p11 }
 0x5e8   : > { %p3318_p10 = por %p3317_p6, %p3316_p5 }
 0x5ea   : > { %p3319_p12 = pnand %p3318_p10, %p3312_p13 }
 0x5ec   : > { %3322 = shalt.err (!%p3319_p12)
}
 0x5ed   : > { %s3384_s9 = smov 128  }
 0x5ee   : > { %2969 = dma.vmem_to_hbm [thread:$0]  (%p4387_p9), %s4316_s29, 896, %s4321_s12, %s4326_s13, %s3384_s9, %s3384_s9, %s3380_s26  }
 0x5ef PF: > { %p2981_p2 = scmp.ge.s32.totalorder %s3361_s24, 2  ;;  %s2221_s11 = sand.u32 1, %s3349_s21  }
 0x5f0   : > { %p4388_p3 = scmp.ne.s32.totalorder %s4379_s8, 0  ;;  %s2222_s14 = scalar_lea.sflag [#allocation5], %s2221_s11 }
 0x5f2   : > { %p2976_p4 = pnand %p2981_p2, %p4388_p3 }
 0x5f4   : > { %3344 = dma.done.wait (!%p2976_p4), %s2222_s14, 896  }
 0x5f5   : > { %3346 = vsyncadd (!%p2976_p4), %s2222_s14, 4294966400  ;;  %p17_p7 = scmp.ge.s32.totalorder %s3445_s27, 4   ;;  %s4389_s21 = smov %s3353_s22 }
 0x5f6   : > { %s4390_s22 = smov %s3357_s23  ;;  %s4391_s23 = smov %s3456_s30 }
 0x5f7   : > { %s4392_s24 = smov %s3445_s27  ;;  %19 = sbr.rel (!%p17_p7) target bundleno = 4 (0x4), region = 87 }
 0x5fe   :  { %2227 = vsyncpa [#allocation4], 1 }
 0x5ff   :  { %2229 = vsyncpa [#allocation4 + $0x1], 1 }
 0x600   :  { %2230 = vsyncpa [#allocation5], 1 }
 0x601   :  { %2232 = vsyncpa [#allocation5 + $0x1], 1 }

</bundles_post_ra>
